<compile_context>
chip_gen: v6e
topology: v6e:2x2x1
jax: 0.10.0
libtpu: 0.0.40
codegen_flags: <defaults>
</compile_context>

<pallas_src>
import math
from functools import partial

import jax
import jax.numpy as jnp
from jax import lax
from jax.experimental import pallas as pl
from jax.experimental.pallas import tpu as pltpu

PAD = 0  # Constants.PAD


# ---------------------------------------------------------------------------
# Fused encoder-stack kernel: one grid step == one EncoderLayer.
# ---------------------------------------------------------------------------
def _layer_norm(x, gamma, beta, eps):
    # One-pass statistics (E[x], E[x^2]); rsqrt goes to the EUP.
    mu = jnp.mean(x, axis=-1, keepdims=True)
    ms = jnp.mean(x * x, axis=-1, keepdims=True)
    var = ms - mu * mu
    return (x - mu) * lax.rsqrt(var + eps) * gamma + beta


def _encoder_stack_kernel(L, BL, D, H, d_k, d_v, d_i, eps,
                          x0_hbm, kp_ref, wqkv_ref, wo_ref, ffn_ref, sm_ref,
                          out_ref, copy_sem):
    layer = pl.program_id(0)
    Hdk = H * d_k
    Hdv = H * d_v
    Wqkv = 2 * Hdk + Hdv

    # Seed the resident activation once from HBM; x0 never enters the per-step
    # pipeline (no VMEM double-buffer, no per-layer DMA stream for it).
    @pl.when(layer == 0)
    def _seed():
        cp = pltpu.make_async_copy(x0_hbm, out_ref, copy_sem)
        cp.start()
        cp.wait()

    x = out_ref[...]                                   # (BL, D) f32, resident

    # ---- attention mask rebuilt from the (1, BL) key-pad row ---------------
    # PAD key (same batch)  -> replace score with -1e9 (matches masked_fill)
    # cross-batch key       -> replace score with -2e9 (flattened-batch isolation)
    kp = kp_ref[...]                                   # (1, BL), 1.0 == PAD key
    inv_L = jnp.float32(1.0 / L)
    ri = lax.broadcasted_iota(jnp.int32, (BL, BL), 0).astype(jnp.float32)
    ci = lax.broadcasted_iota(jnp.int32, (BL, BL), 1).astype(jnp.float32)
    cross = jnp.floor((ri + 0.5) * inv_L) != jnp.floor((ci + 0.5) * inv_L)
    padk = jnp.broadcast_to(kp > 0.5, (BL, BL))
    masked = jnp.logical_or(cross, padk)
    fill = jnp.where(cross, jnp.float32(-2.0e9), jnp.float32(-1.0e9))

    sm = sm_ref[0]                                     # (8, Wsm) f32 bias/LN slab
    bqkv = sm[0:1, 0:Wqkv]
    bo = sm[1:2, 0:D]
    b1 = sm[2:3, 0:d_i]
    b2 = sm[3:4, 0:D]
    g1, be1 = sm[4:5, 0:D], sm[5:6, 0:D]
    g2, be2 = sm[6:7, 0:D], sm[7:8, 0:D]

    # ---- multi-head self-attention -----------------------------------------
    residual = x
    xb = x.astype(jnp.bfloat16)
    qkv = jnp.dot(xb, wqkv_ref[0], preferred_element_type=jnp.float32) + bqkv
    q = qkv[:, 0:Hdk]
    k = qkv[:, Hdk:2 * Hdk]
    v = qkv[:, 2 * Hdk:2 * Hdk + Hdv].astype(jnp.bfloat16)
    scale = jnp.float32(1.0 / math.sqrt(d_k))

    ctx = []
    for h in range(H):                                 # H small & static -> unrolled
        qh = (q[:, h * d_k:(h + 1) * d_k] * scale).astype(jnp.bfloat16)
        kh = k[:, h * d_k:(h + 1) * d_k].astype(jnp.bfloat16)
        s = lax.dot_general(qh, kh, (((1,), (1,)), ((), ())),
                            preferred_element_type=jnp.float32)
        s = jnp.where(masked, fill, s)
        s = s - jnp.max(s, axis=-1, keepdims=True)
        p = jnp.exp(s)
        p = p * pl.reciprocal(jnp.sum(p, axis=-1, keepdims=True), approx=True)
        ctx.append(jnp.dot(p.astype(jnp.bfloat16), v[:, h * d_v:(h + 1) * d_v],
                           preferred_element_type=jnp.float32))
    ctx = jnp.concatenate(ctx, axis=-1).astype(jnp.bfloat16)   # (BL, H*dv)
    o = jnp.dot(ctx, wo_ref[0], preferred_element_type=jnp.float32) + bo
    x = _layer_norm(o + residual, g1, be1, eps)

    # ---- position-wise feed-forward -----------------------------------------
    residual = x
    xb = x.astype(jnp.bfloat16)
    hid = jnp.dot(xb, ffn_ref[0, 0:D, 0:d_i],
                  preferred_element_type=jnp.float32) + b1
    hid = jnp.maximum(hid, 0.0).astype(jnp.bfloat16)
    o2 = jnp.dot(hid, ffn_ref[0, D:D + d_i, 0:D],
                 preferred_element_type=jnp.float32) + b2
    x = _layer_norm(o2 + residual, g2, be2, eps)

    out_ref[...] = x


# ---------------------------------------------------------------------------
# Wrapper: embedding glue + single pallas_call over the layer stack.
# ---------------------------------------------------------------------------
def make_sinusoid_table(max_pos, d_model, padding_idx=None):
    half = d_model / 2
    magic = math.log(10000.0) / half
    magic = jnp.exp(jnp.arange(half, dtype=jnp.float32) * -magic)
    ang = jnp.arange(max_pos, dtype=jnp.float32)[:, None] * magic[None, :]
    tab = jnp.concatenate([jnp.sin(ang)[..., None], jnp.cos(ang)[..., None]],
                          axis=2)
    tab = tab.reshape(max_pos, -1)
    if padding_idx is not None:
        tab = tab.at[padding_idx].set(0.0)
    return tab


def encoder_forward(params, src_seq, src_pos, cfg):
    B, L = src_seq.shape
    D, H = cfg["d_model"], cfg["head_num"]
    dk, dv, di, NL = cfg["d_k"], cfg["d_v"], cfg["d_inner"], cfg["layer_num"]
    BL = B * L
    Wqkv = 2 * H * dk + H * dv
    Wff = max(di, D)
    Wsm = max(Wqkv, di, D)

    # Embedding * sqrt(d_model) + positional encoding (gathers stay in JAX).
    x0 = (jnp.take(params["embedding"], src_seq, axis=0) * jnp.float32(math.sqrt(D))
          + jnp.take(params["pos_table"], src_pos, axis=0))
    x0 = x0.reshape(BL, D).astype(jnp.float32)
    # TODO(synk): nn.Dropout layers are identity (inference semantics).

    # Only a (1, BL) key-pad row is shipped; pad/cross-batch mask built in-kernel.
    keypad = (src_seq.reshape(1, BL) == PAD).astype(jnp.float32)

    # Coalesce 13 per-layer parameter tensors into 4 streamed slabs
    # (bf16 weights for native-rate MXU, f32 bias + LayerNorm slab).
    p = params["layers"]
    wqkv = jnp.concatenate([p["wq"], p["wk"], p["wv"]], axis=2).astype(jnp.bfloat16)
    wo = p["wo"].astype(jnp.bfloat16)
    ffn = jnp.zeros((NL, D + di, Wff), jnp.float32)
    ffn = ffn.at[:, 0:D, 0:di].set(p["w1"]).at[:, D:D + di, 0:D].set(p["w2"])
    ffn = ffn.astype(jnp.bfloat16)
    small = jnp.zeros((NL, 8, Wsm), jnp.float32)
    small = small.at[:, 0, 0:Wqkv].set(
        jnp.concatenate([p["bq"], p["bk"], p["bv"]], axis=1))
    small = small.at[:, 1, 0:D].set(p["bo"])
    small = small.at[:, 2, 0:di].set(p["b1"])
    small = small.at[:, 3, 0:D].set(p["b2"])
    small = small.at[:, 4:8, 0:D].set(p["ln"])

    kernel = partial(_encoder_stack_kernel, L, BL, D, H, dk, dv, di, 1e-5)

    # Explicit VMEM budget: double-buffered weight slabs + activations + slack.
    wbytes = 2 * (D * Wqkv + H * dv * D + (D + di) * Wff) + 4 * 8 * Wsm
    abytes = 4 * BL * (D + Wqkv + di) + 4 * BL * BL * 4
    vmem_budget = int(min(64 * 1024 * 1024,
                          max(16 * 1024 * 1024, 6 * (wbytes + abytes))))

    # TODO(synk): for realistic B*L add a query-tile grid axis (flash-style
    # online softmax) and block the FFN over d_inner; on v7x additionally shard
    # the token axis across the two TensorCores.
    out = pl.pallas_call(
        kernel,
        out_shape=jax.ShapeDtypeStruct((BL, D), jnp.float32),
        grid_spec=pltpu.PrefetchScalarGridSpec(
            num_scalar_prefetch=0,
            grid=(NL,),
            in_specs=[
                pl.BlockSpec(memory_space=pl.ANY),                    # x0 stays in HBM
                pl.BlockSpec((1, BL), lambda l: (0, 0)),              # key-pad row
                pl.BlockSpec((1, D, Wqkv), lambda l: (l, 0, 0)),      # fused QKV weight
                pl.BlockSpec((1, H * dv, D), lambda l: (l, 0, 0)),    # output projection
                pl.BlockSpec((1, D + di, Wff), lambda l: (l, 0, 0)),  # FFN slab (w1|w2)
                pl.BlockSpec((1, 8, Wsm), lambda l: (l, 0, 0)),       # biases + LN slab
            ],
            out_specs=pl.BlockSpec((BL, D), lambda l: (0, 0)),
            scratch_shapes=[pltpu.SemaphoreType.DMA],
        ),
        compiler_params=pltpu.CompilerParams(
            dimension_semantics=("arbitrary",),
            vmem_limit_bytes=vmem_budget),
    )(x0, keypad, wqkv, wo, ffn, small)
    return out.reshape(B, L, D)


# ---------------------------------------------------------------------------
# Deterministic parameter initialization (stacked per layer, PyTorch layout).
# ---------------------------------------------------------------------------
class KeyGen:
    def __init__(self, key):
        self.key = key

    def __call__(self):
        self.key, sub = jax.random.split(self.key)
        return sub


def init_params(key, cfg):
    kg = KeyGen(key)
    D, H = cfg["d_model"], cfg["head_num"]
    dk, dv, di, NL = cfg["d_k"], cfg["d_v"], cfg["d_inner"], cfg["layer_num"]

    def dense(d_in, d_out):
        w = jax.random.normal(kg(), (d_in, d_out), jnp.float32) / math.sqrt(d_in)
        # Round weights through bf16 so the bf16-MXU kernel and the f32
        # reference share identical weight values (check isolates kernel math).
        w = w.astype(jnp.bfloat16).astype(jnp.float32)
        b = 0.1 * jax.random.normal(kg(), (d_out,), jnp.float32)
        return w, b

    acc = {k: [] for k in ("wq", "wk", "wv", "bq", "bk", "bv",
                           "wo", "bo", "w1", "b1", "w2", "b2", "ln")}
    for _ in range(NL):
        wq, bq = dense(D, H * dk)
        wk, bk = dense(D, H * dk)
        wv, bv = dense(D, H * dv)
        wo, bo = dense(H * dv, D)
        w1, b1 = dense(D, di)
        w2, b2 = dense(di, D)
        for n, v in (("wq", wq), ("wk", wk), ("wv", wv), ("bq", bq), ("bk", bk),
                     ("bv", bv), ("wo", wo), ("bo", bo), ("w1", w1), ("b1", b1),
                     ("w2", w2), ("b2", b2)):
            acc[n].append(v)
        g1 = 1.0 + 0.1 * jax.random.normal(kg(), (D,), jnp.float32)
        be1 = 0.1 * jax.random.normal(kg(), (D,), jnp.float32)
        g2 = 1.0 + 0.1 * jax.random.normal(kg(), (D,), jnp.float32)
        be2 = 0.1 * jax.random.normal(kg(), (D,), jnp.float32)
        acc["ln"].append(jnp.stack([g1, be1, g2, be2]))
    layers = {k: jnp.stack(v) for k, v in acc.items()}

    emb = jax.random.normal(kg(), (cfg["src_vocab"], D), jnp.float32) * D ** -0.5
    emb = emb.at[PAD].set(0.0)
    pos = make_sinusoid_table(cfg["max_position_num"], D, padding_idx=PAD)
    return {"embedding": emb, "pos_table": pos, "layers": layers}


# ---------------------------------------------------------------------------
# Pure-JAX reference (mirrors the PyTorch Encoder forward, f32 everywhere).
# ---------------------------------------------------------------------------
def encoder_reference(params, src_seq, src_pos, cfg):
    D, H = cfg["d_model"], cfg["head_num"]
    dk, dv, NL = cfg["d_k"], cfg["d_v"], cfg["layer_num"]
    B, L = src_seq.shape
    hi = jax.lax.Precision.HIGHEST
    x = (jnp.take(params["embedding"], src_seq, axis=0) * math.sqrt(D)
         + jnp.take(params["pos_table"], src_pos, axis=0))
    pad = (src_seq == PAD)[:, None, None, :]                    # (B,1,1,L)
    p = params["layers"]

    def ln(y, g, b):
        mu = y.mean(-1, keepdims=True)
        var = ((y - mu) ** 2).mean(-1, keepdims=True)
        return (y - mu) / jnp.sqrt(var + 1e-5) * g + b

    for l in range(NL):
        wq = p["wq"][l].reshape(D, H, dk)
        wk = p["wk"][l].reshape(D, H, dk)
        wv = p["wv"][l].reshape(D, H, dv)
        q = jnp.einsum("bld,dhe->bhle", x, wq, precision=hi) \
            + p["bq"][l].reshape(H, dk)[None, :, None, :]
        k = jnp.einsum("bld,dhe->bhle", x, wk, precision=hi) \
            + p["bk"][l].reshape(H, dk)[None, :, None, :]
        v = jnp.einsum("bld,dhe->bhle", x, wv, precision=hi) \
            + p["bv"][l].reshape(H, dv)[None, :, None, :]
        s = jnp.einsum("bhqe,bhke->bhqk", q, k, precision=hi) * (1.0 / math.sqrt(dk))
        s = jnp.where(pad, -1e9, s)
        a = jax.nn.softmax(s, axis=-1)
        ctx = jnp.einsum("bhqk,bhke->bhqe", a, v, precision=hi)    # (B,H,L,dv)
        ctx = ctx.transpose(0, 2, 1, 3).reshape(B, L, H * dv)
        o = jnp.dot(ctx, p["wo"][l], precision=hi) + p["bo"][l]
        x = ln(o + x, p["ln"][l][0], p["ln"][l][1])
        res = x
        hid = jax.nn.relu(jnp.dot(x, p["w1"][l], precision=hi) + p["b1"][l])
        o2 = jnp.dot(hid, p["w2"][l], precision=hi) + p["b2"][l]
        x = ln(o2 + res, p["ln"][l][2], p["ln"][l][3])
    return x


# ---------------------------------------------------------------------------
if __name__ == "__main__":
    # Lane-dense small config: D=128, H*dk=H*dv=128, d_inner=256.
    cfg = dict(d_model=128, head_num=4, d_k=32, d_v=32, d_inner=256, layer_num=2,
               src_vocab=50, max_position_num=20)

    key = jax.random.PRNGKey(0)
    k_seq, k_par = jax.random.split(key)

    B, L = 2, 8
    src_seq = jax.random.randint(k_seq, (B, L), 1, cfg["src_vocab"], jnp.int32)
    src_seq = src_seq.at[1, 6:].set(PAD)                        # pad tail of row 1
    src_pos = jnp.where(src_seq != PAD,
                        jnp.arange(1, L + 1, dtype=jnp.int32)[None, :], 0)
    src_pos = src_pos.astype(jnp.int32)

    params = init_params(k_par, cfg)

    fwd = jax.jit(lambda p, s, sp: encoder_forward(p, s, sp, cfg))
    enc_out = fwd(params, src_seq, src_pos)
    jax.block_until_ready(enc_out)

    assert enc_out.shape == (B, L, cfg["d_model"]), enc_out.shape
    assert bool(jnp.all(jnp.isfinite(enc_out)))

    ref_out = jax.jit(lambda p, s, sp: encoder_reference(p, s, sp, cfg))(
        params, src_seq, src_pos)
    err = float(jnp.max(jnp.abs(enc_out - ref_out)))
    assert err < 5e-2, f"mismatch vs pure-JAX reference: {err}"

    print("KERNEL_OK")
</pallas_src>

<mosaic_0001>
module attributes {stable_mosaic.version = 11 : i64} {
  func.func @_encoder_stack_kernel(%arg0: i32, %arg1: memref<16x128xf32, #tpu.memory_space<any>>, %arg2: memref<1x16xf32, #tpu.memory_space<vmem>>, %arg3: memref<1x128x384xbf16, #tpu.memory_space<vmem>>, %arg4: memref<1x128x128xbf16, #tpu.memory_space<vmem>>, %arg5: memref<1x384x256xbf16, #tpu.memory_space<vmem>>, %arg6: memref<1x8x384xf32, #tpu.memory_space<vmem>>, %arg7: memref<16x128xf32, #tpu.memory_space<vmem>>, %arg8: memref<!tpu.dma_semaphore, #tpu.memory_space<semaphore_mem>>) attributes {dimension_semantics = [#tpu.dimension_semantics<arbitrary>], iteration_bounds = array<i64: 2>, scalar_prefetch = 0 : i64, scratch_operands = 1 : i64, tpu.core_type = #tpu.core_type<tc>, window_params = [{}, {pipeline_mode = #tpu.pipeline_mode<synchronous>, transform_indices = @transform_1, window_bounds = array<i64: 1, 16>}, {transform_indices = @transform_2, window_bounds = array<i64: 1, 128, 384>}, {transform_indices = @transform_3, window_bounds = array<i64: 1, 128, 128>}, {transform_indices = @transform_4, window_bounds = array<i64: 1, 384, 256>}, {transform_indices = @transform_5, window_bounds = array<i64: 1, 8, 384>}, {pipeline_mode = #tpu.pipeline_mode<synchronous>, transform_indices = @transform_6, window_bounds = array<i64: 16, 128>}]} {
    %c0_i32 = arith.constant 0 : i32
    %0 = arith.cmpi eq, %arg0, %c0_i32 : i32
    %1 = arith.extui %0 : i1 to i32
    %c0_i32_0 = arith.constant 0 : i32
    %2 = arith.cmpi ne, %1, %c0_i32_0 : i32
    scf.if %2 {
      tpu.enqueue_dma source(%arg1 : memref<16x128xf32, #tpu.memory_space<any>>) target(%arg7 : memref<16x128xf32, #tpu.memory_space<vmem>>) target_semaphore(%arg8 : memref<!tpu.dma_semaphore, #tpu.memory_space<semaphore_mem>>)
      tpu.wait_dma2 semaphore(%arg8 : memref<!tpu.dma_semaphore, #tpu.memory_space<semaphore_mem>>) src(%arg1 : memref<16x128xf32, #tpu.memory_space<any>>) dst(%arg7 : memref<16x128xf32, #tpu.memory_space<vmem>>)
    } else {
    }
    %c0 = arith.constant 0 : index
    %c0_1 = arith.constant 0 : index
    %3 = vector.load %arg7[%c0, %c0_1] : memref<16x128xf32, #tpu.memory_space<vmem>>, vector<16x128xf32>
    %c0_2 = arith.constant 0 : index
    %c0_3 = arith.constant 0 : index
    %4 = vector.load %arg2[%c0_2, %c0_3] : memref<1x16xf32, #tpu.memory_space<vmem>>, vector<1x16xf32>
    %5 = tpu.iota {dimensions = array<i32: 0>} : vector<16x16xi32>
    %6 = arith.sitofp %5 : vector<16x16xi32> to vector<16x16xf32>
    %7 = tpu.iota {dimensions = array<i32: 1>} : vector<16x16xi32>
    %8 = arith.sitofp %7 : vector<16x16xi32> to vector<16x16xf32>
    %cst = arith.constant 5.000000e-01 : f32
    %9 = vector.broadcast %cst : f32 to vector<16x16xf32>
    %10 = arith.addf %6, %9 : vector<16x16xf32>
    %cst_4 = arith.constant 1.250000e-01 : f32
    %11 = vector.broadcast %cst_4 : f32 to vector<16x16xf32>
    %12 = arith.mulf %10, %11 : vector<16x16xf32>
    %13 = math.floor %12 : vector<16x16xf32>
    %cst_5 = arith.constant 5.000000e-01 : f32
    %14 = vector.broadcast %cst_5 : f32 to vector<16x16xf32>
    %15 = arith.addf %8, %14 : vector<16x16xf32>
    %cst_6 = arith.constant 1.250000e-01 : f32
    %16 = vector.broadcast %cst_6 : f32 to vector<16x16xf32>
    %17 = arith.mulf %15, %16 : vector<16x16xf32>
    %18 = math.floor %17 : vector<16x16xf32>
    %19 = arith.cmpf one, %13, %18 : vector<16x16xf32>
    %cst_7 = arith.constant 5.000000e-01 : f32
    %20 = vector.broadcast %cst_7 : f32 to vector<1x16xf32>
    %21 = arith.cmpf ogt, %4, %20 : vector<1x16xf32>
    %22 = vector.shape_cast %21 : vector<1x16xi1> to vector<1x16xi1>
    %23 = vector.broadcast %22 : vector<1x16xi1> to vector<16x16xi1>
    %24 = arith.ori %19, %23 : vector<16x16xi1>
    %cst_8 = arith.constant -2.000000e+09 : f32
    %cst_9 = arith.constant -1.000000e+09 : f32
    %25 = vector.broadcast %cst_8 : f32 to vector<16x16xf32>
    %26 = vector.broadcast %cst_9 : f32 to vector<16x16xf32>
    %27 = arith.select %19, %25, %26 : vector<16x16xi1>, vector<16x16xf32>
    %c0_10 = arith.constant 0 : index
    %c0_11 = arith.constant 0 : index
    %c0_12 = arith.constant 0 : index
    %28 = vector.load %arg6[%c0_10, %c0_11, %c0_12] : memref<1x8x384xf32, #tpu.memory_space<vmem>>, vector<1x8x384xf32>
    %29 = vector.shape_cast %28 : vector<1x8x384xf32> to vector<8x384xf32>
    %30 = vector.extract_strided_slice %29 {offsets = [0, 0], sizes = [1, 384], strides = [1, 1]} : vector<8x384xf32> to vector<1x384xf32>
    %31 = vector.extract_strided_slice %29 {offsets = [1, 0], sizes = [1, 128], strides = [1, 1]} : vector<8x384xf32> to vector<1x128xf32>
    %32 = vector.extract_strided_slice %29 {offsets = [2, 0], sizes = [1, 256], strides = [1, 1]} : vector<8x384xf32> to vector<1x256xf32>
    %33 = vector.extract_strided_slice %29 {offsets = [3, 0], sizes = [1, 128], strides = [1, 1]} : vector<8x384xf32> to vector<1x128xf32>
    %34 = vector.extract_strided_slice %29 {offsets = [4, 0], sizes = [1, 128], strides = [1, 1]} : vector<8x384xf32> to vector<1x128xf32>
    %35 = vector.extract_strided_slice %29 {offsets = [5, 0], sizes = [1, 128], strides = [1, 1]} : vector<8x384xf32> to vector<1x128xf32>
    %36 = vector.extract_strided_slice %29 {offsets = [6, 0], sizes = [1, 128], strides = [1, 1]} : vector<8x384xf32> to vector<1x128xf32>
    %37 = vector.extract_strided_slice %29 {offsets = [7, 0], sizes = [1, 128], strides = [1, 1]} : vector<8x384xf32> to vector<1x128xf32>
    %38 = arith.truncf %3 : vector<16x128xf32> to vector<16x128xbf16>
    %c0_13 = arith.constant 0 : index
    %c0_14 = arith.constant 0 : index
    %c0_15 = arith.constant 0 : index
    %39 = vector.load %arg3[%c0_13, %c0_14, %c0_15] : memref<1x128x384xbf16, #tpu.memory_space<vmem>>, vector<1x128x384xbf16>
    %40 = vector.shape_cast %39 : vector<1x128x384xbf16> to vector<128x384xbf16>
    %cst_16 = arith.constant dense<0.000000e+00> : vector<16x384xf32>
    %41 = tpu.matmul %38, %40, %cst_16 {dimension_numbers = #tpu.dot_dimension_numbers<[1], [0], [0], [1], [0, 0, 1, 1], [], []>} : vector<16x128xbf16>, vector<128x384xbf16>, vector<16x384xf32> -> vector<16x384xf32>
    %42 = vector.broadcast %30 : vector<1x384xf32> to vector<16x384xf32>
    %43 = arith.addf %41, %42 : vector<16x384xf32>
    %44 = vector.extract_strided_slice %43 {offsets = [0, 0], sizes = [16, 128], strides = [1, 1]} : vector<16x384xf32> to vector<16x128xf32>
    %45 = vector.extract_strided_slice %43 {offsets = [0, 128], sizes = [16, 128], strides = [1, 1]} : vector<16x384xf32> to vector<16x128xf32>
    %46 = vector.extract_strided_slice %43 {offsets = [0, 256], sizes = [16, 128], strides = [1, 1]} : vector<16x384xf32> to vector<16x128xf32>
    %47 = arith.truncf %46 : vector<16x128xf32> to vector<16x128xbf16>
    %48 = vector.extract_strided_slice %44 {offsets = [0, 0], sizes = [16, 32], strides = [1, 1]} : vector<16x128xf32> to vector<16x32xf32>
    %cst_17 = arith.constant 0.176776692 : f32
    %49 = vector.broadcast %cst_17 : f32 to vector<16x32xf32>
    %50 = arith.mulf %48, %49 : vector<16x32xf32>
    %51 = arith.truncf %50 : vector<16x32xf32> to vector<16x32xbf16>
    %52 = vector.extract_strided_slice %45 {offsets = [0, 0], sizes = [16, 32], strides = [1, 1]} : vector<16x128xf32> to vector<16x32xf32>
    %53 = arith.truncf %52 : vector<16x32xf32> to vector<16x32xbf16>
    %cst_18 = arith.constant dense<0.000000e+00> : vector<16x16xf32>
    %54 = tpu.matmul %51, %53, %cst_18 {dimension_numbers = #tpu.dot_dimension_numbers<[1], [1], [0], [0], [0, 0, 1, 0], [], []>} : vector<16x32xbf16>, vector<16x32xbf16>, vector<16x16xf32> -> vector<16x16xf32>
    %55 = arith.select %24, %27, %54 : vector<16x16xi1>, vector<16x16xf32>
    %cst_19 = arith.constant dense<0xFF800000> : vector<16xf32>
    %56 = vector.multi_reduction <maximumf>, %55, %cst_19 [1] : vector<16x16xf32> to vector<16xf32>
    %57 = vector.shape_cast %56 : vector<16xf32> to vector<16x1xf32>
    %58 = vector.broadcast %57 : vector<16x1xf32> to vector<16x16xf32>
    %59 = arith.subf %55, %58 : vector<16x16xf32>
    %60 = math.exp %59 : vector<16x16xf32>
    %cst_20 = arith.constant dense<0.000000e+00> : vector<16xf32>
    %61 = vector.multi_reduction <add>, %60, %cst_20 [1] : vector<16x16xf32> to vector<16xf32>
    %62 = vector.shape_cast %61 : vector<16xf32> to vector<16x1xf32>
    %63 = tpu.reciprocal %62 {approx = true} : vector<16x1xf32> -> vector<16x1xf32>
    %64 = vector.broadcast %63 : vector<16x1xf32> to vector<16x16xf32>
    %65 = arith.mulf %60, %64 : vector<16x16xf32>
    %66 = arith.truncf %65 : vector<16x16xf32> to vector<16x16xbf16>
    %67 = vector.extract_strided_slice %47 {offsets = [0, 0], sizes = [16, 32], strides = [1, 1]} : vector<16x128xbf16> to vector<16x32xbf16>
    %cst_21 = arith.constant dense<0.000000e+00> : vector<16x32xf32>
    %68 = tpu.matmul %66, %67, %cst_21 {dimension_numbers = #tpu.dot_dimension_numbers<[1], [0], [0], [1], [0, 0, 1, 1], [], []>} : vector<16x16xbf16>, vector<16x32xbf16>, vector<16x32xf32> -> vector<16x32xf32>
    %69 = vector.extract_strided_slice %44 {offsets = [0, 32], sizes = [16, 32], strides = [1, 1]} : vector<16x128xf32> to vector<16x32xf32>
    %cst_22 = arith.constant 0.176776692 : f32
    %70 = vector.broadcast %cst_22 : f32 to vector<16x32xf32>
    %71 = arith.mulf %69, %70 : vector<16x32xf32>
    %72 = arith.truncf %71 : vector<16x32xf32> to vector<16x32xbf16>
    %73 = vector.extract_strided_slice %45 {offsets = [0, 32], sizes = [16, 32], strides = [1, 1]} : vector<16x128xf32> to vector<16x32xf32>
    %74 = arith.truncf %73 : vector<16x32xf32> to vector<16x32xbf16>
    %cst_23 = arith.constant dense<0.000000e+00> : vector<16x16xf32>
    %75 = tpu.matmul %72, %74, %cst_23 {dimension_numbers = #tpu.dot_dimension_numbers<[1], [1], [0], [0], [0, 0, 1, 0], [], []>} : vector<16x32xbf16>, vector<16x32xbf16>, vector<16x16xf32> -> vector<16x16xf32>
    %76 = arith.select %24, %27, %75 : vector<16x16xi1>, vector<16x16xf32>
    %cst_24 = arith.constant dense<0xFF800000> : vector<16xf32>
    %77 = vector.multi_reduction <maximumf>, %76, %cst_24 [1] : vector<16x16xf32> to vector<16xf32>
    %78 = vector.shape_cast %77 : vector<16xf32> to vector<16x1xf32>
    %79 = vector.broadcast %78 : vector<16x1xf32> to vector<16x16xf32>
    %80 = arith.subf %76, %79 : vector<16x16xf32>
    %81 = math.exp %80 : vector<16x16xf32>
    %cst_25 = arith.constant dense<0.000000e+00> : vector<16xf32>
    %82 = vector.multi_reduction <add>, %81, %cst_25 [1] : vector<16x16xf32> to vector<16xf32>
    %83 = vector.shape_cast %82 : vector<16xf32> to vector<16x1xf32>
    %84 = tpu.reciprocal %83 {approx = true} : vector<16x1xf32> -> vector<16x1xf32>
    %85 = vector.broadcast %84 : vector<16x1xf32> to vector<16x16xf32>
    %86 = arith.mulf %81, %85 : vector<16x16xf32>
    %87 = arith.truncf %86 : vector<16x16xf32> to vector<16x16xbf16>
    %88 = vector.extract_strided_slice %47 {offsets = [0, 32], sizes = [16, 32], strides = [1, 1]} : vector<16x128xbf16> to vector<16x32xbf16>
    %cst_26 = arith.constant dense<0.000000e+00> : vector<16x32xf32>
    %89 = tpu.matmul %87, %88, %cst_26 {dimension_numbers = #tpu.dot_dimension_numbers<[1], [0], [0], [1], [0, 0, 1, 1], [], []>} : vector<16x16xbf16>, vector<16x32xbf16>, vector<16x32xf32> -> vector<16x32xf32>
    %90 = vector.extract_strided_slice %44 {offsets = [0, 64], sizes = [16, 32], strides = [1, 1]} : vector<16x128xf32> to vector<16x32xf32>
    %cst_27 = arith.constant 0.176776692 : f32
    %91 = vector.broadcast %cst_27 : f32 to vector<16x32xf32>
    %92 = arith.mulf %90, %91 : vector<16x32xf32>
    %93 = arith.truncf %92 : vector<16x32xf32> to vector<16x32xbf16>
    %94 = vector.extract_strided_slice %45 {offsets = [0, 64], sizes = [16, 32], strides = [1, 1]} : vector<16x128xf32> to vector<16x32xf32>
    %95 = arith.truncf %94 : vector<16x32xf32> to vector<16x32xbf16>
    %cst_28 = arith.constant dense<0.000000e+00> : vector<16x16xf32>
    %96 = tpu.matmul %93, %95, %cst_28 {dimension_numbers = #tpu.dot_dimension_numbers<[1], [1], [0], [0], [0, 0, 1, 0], [], []>} : vector<16x32xbf16>, vector<16x32xbf16>, vector<16x16xf32> -> vector<16x16xf32>
    %97 = arith.select %24, %27, %96 : vector<16x16xi1>, vector<16x16xf32>
    %cst_29 = arith.constant dense<0xFF800000> : vector<16xf32>
    %98 = vector.multi_reduction <maximumf>, %97, %cst_29 [1] : vector<16x16xf32> to vector<16xf32>
    %99 = vector.shape_cast %98 : vector<16xf32> to vector<16x1xf32>
    %100 = vector.broadcast %99 : vector<16x1xf32> to vector<16x16xf32>
    %101 = arith.subf %97, %100 : vector<16x16xf32>
    %102 = math.exp %101 : vector<16x16xf32>
    %cst_30 = arith.constant dense<0.000000e+00> : vector<16xf32>
    %103 = vector.multi_reduction <add>, %102, %cst_30 [1] : vector<16x16xf32> to vector<16xf32>
    %104 = vector.shape_cast %103 : vector<16xf32> to vector<16x1xf32>
    %105 = tpu.reciprocal %104 {approx = true} : vector<16x1xf32> -> vector<16x1xf32>
    %106 = vector.broadcast %105 : vector<16x1xf32> to vector<16x16xf32>
    %107 = arith.mulf %102, %106 : vector<16x16xf32>
    %108 = arith.truncf %107 : vector<16x16xf32> to vector<16x16xbf16>
    %109 = vector.extract_strided_slice %47 {offsets = [0, 64], sizes = [16, 32], strides = [1, 1]} : vector<16x128xbf16> to vector<16x32xbf16>
    %cst_31 = arith.constant dense<0.000000e+00> : vector<16x32xf32>
    %110 = tpu.matmul %108, %109, %cst_31 {dimension_numbers = #tpu.dot_dimension_numbers<[1], [0], [0], [1], [0, 0, 1, 1], [], []>} : vector<16x16xbf16>, vector<16x32xbf16>, vector<16x32xf32> -> vector<16x32xf32>
    %111 = vector.extract_strided_slice %44 {offsets = [0, 96], sizes = [16, 32], strides = [1, 1]} : vector<16x128xf32> to vector<16x32xf32>
    %cst_32 = arith.constant 0.176776692 : f32
    %112 = vector.broadcast %cst_32 : f32 to vector<16x32xf32>
    %113 = arith.mulf %111, %112 : vector<16x32xf32>
    %114 = arith.truncf %113 : vector<16x32xf32> to vector<16x32xbf16>
    %115 = vector.extract_strided_slice %45 {offsets = [0, 96], sizes = [16, 32], strides = [1, 1]} : vector<16x128xf32> to vector<16x32xf32>
    %116 = arith.truncf %115 : vector<16x32xf32> to vector<16x32xbf16>
    %cst_33 = arith.constant dense<0.000000e+00> : vector<16x16xf32>
    %117 = tpu.matmul %114, %116, %cst_33 {dimension_numbers = #tpu.dot_dimension_numbers<[1], [1], [0], [0], [0, 0, 1, 0], [], []>} : vector<16x32xbf16>, vector<16x32xbf16>, vector<16x16xf32> -> vector<16x16xf32>
    %118 = arith.select %24, %27, %117 : vector<16x16xi1>, vector<16x16xf32>
    %cst_34 = arith.constant dense<0xFF800000> : vector<16xf32>
    %119 = vector.multi_reduction <maximumf>, %118, %cst_34 [1] : vector<16x16xf32> to vector<16xf32>
    %120 = vector.shape_cast %119 : vector<16xf32> to vector<16x1xf32>
    %121 = vector.broadcast %120 : vector<16x1xf32> to vector<16x16xf32>
    %122 = arith.subf %118, %121 : vector<16x16xf32>
    %123 = math.exp %122 : vector<16x16xf32>
    %cst_35 = arith.constant dense<0.000000e+00> : vector<16xf32>
    %124 = vector.multi_reduction <add>, %123, %cst_35 [1] : vector<16x16xf32> to vector<16xf32>
    %125 = vector.shape_cast %124 : vector<16xf32> to vector<16x1xf32>
    %126 = tpu.reciprocal %125 {approx = true} : vector<16x1xf32> -> vector<16x1xf32>
    %127 = vector.broadcast %126 : vector<16x1xf32> to vector<16x16xf32>
    %128 = arith.mulf %123, %127 : vector<16x16xf32>
    %129 = arith.truncf %128 : vector<16x16xf32> to vector<16x16xbf16>
    %130 = vector.extract_strided_slice %47 {offsets = [0, 96], sizes = [16, 32], strides = [1, 1]} : vector<16x128xbf16> to vector<16x32xbf16>
    %cst_36 = arith.constant dense<0.000000e+00> : vector<16x32xf32>
    %131 = tpu.matmul %129, %130, %cst_36 {dimension_numbers = #tpu.dot_dimension_numbers<[1], [0], [0], [1], [0, 0, 1, 1], [], []>} : vector<16x16xbf16>, vector<16x32xbf16>, vector<16x32xf32> -> vector<16x32xf32>
    %132 = tpu.concatenate %68, %89, %110, %131 in 1 : vector<16x32xf32>, vector<16x32xf32>, vector<16x32xf32>, vector<16x32xf32> -> vector<16x128xf32>
    %133 = arith.truncf %132 : vector<16x128xf32> to vector<16x128xbf16>
    %c0_37 = arith.constant 0 : index
    %c0_38 = arith.constant 0 : index
    %c0_39 = arith.constant 0 : index
    %134 = vector.load %arg4[%c0_37, %c0_38, %c0_39] : memref<1x128x128xbf16, #tpu.memory_space<vmem>>, vector<1x128x128xbf16>
    %135 = vector.shape_cast %134 : vector<1x128x128xbf16> to vector<128x128xbf16>
    %cst_40 = arith.constant dense<0.000000e+00> : vector<16x128xf32>
    %136 = tpu.matmul %133, %135, %cst_40 {dimension_numbers = #tpu.dot_dimension_numbers<[1], [0], [0], [1], [0, 0, 1, 1], [], []>} : vector<16x128xbf16>, vector<128x128xbf16>, vector<16x128xf32> -> vector<16x128xf32>
    %137 = vector.broadcast %31 : vector<1x128xf32> to vector<16x128xf32>
    %138 = arith.addf %136, %137 : vector<16x128xf32>
    %139 = arith.addf %138, %3 : vector<16x128xf32>
    %cst_41 = arith.constant dense<0.000000e+00> : vector<16xf32>
    %140 = vector.multi_reduction <add>, %139, %cst_41 [1] : vector<16x128xf32> to vector<16xf32>
    %141 = vector.shape_cast %140 : vector<16xf32> to vector<16x1xf32>
    %cst_42 = arith.constant 1.280000e+02 : f32
    %142 = vector.broadcast %cst_42 : f32 to vector<16x1xf32>
    %143 = arith.divf %141, %142 : vector<16x1xf32>
    %144 = arith.mulf %139, %139 : vector<16x128xf32>
    %cst_43 = arith.constant dense<0.000000e+00> : vector<16xf32>
    %145 = vector.multi_reduction <add>, %144, %cst_43 [1] : vector<16x128xf32> to vector<16xf32>
    %146 = vector.shape_cast %145 : vector<16xf32> to vector<16x1xf32>
    %cst_44 = arith.constant 1.280000e+02 : f32
    %147 = vector.broadcast %cst_44 : f32 to vector<16x1xf32>
    %148 = arith.divf %146, %147 : vector<16x1xf32>
    %149 = arith.mulf %143, %143 : vector<16x1xf32>
    %150 = arith.subf %148, %149 : vector<16x1xf32>
    %151 = vector.broadcast %143 : vector<16x1xf32> to vector<16x128xf32>
    %152 = arith.subf %139, %151 : vector<16x128xf32>
    %cst_45 = arith.constant 9.99999974E-6 : f32
    %153 = vector.broadcast %cst_45 : f32 to vector<16x1xf32>
    %154 = arith.addf %150, %153 : vector<16x1xf32>
    %155 = math.rsqrt %154 : vector<16x1xf32>
    %156 = vector.broadcast %155 : vector<16x1xf32> to vector<16x128xf32>
    %157 = arith.mulf %152, %156 : vector<16x128xf32>
    %158 = vector.broadcast %34 : vector<1x128xf32> to vector<16x128xf32>
    %159 = arith.mulf %157, %158 : vector<16x128xf32>
    %160 = vector.broadcast %35 : vector<1x128xf32> to vector<16x128xf32>
    %161 = arith.addf %159, %160 : vector<16x128xf32>
    %162 = arith.truncf %161 : vector<16x128xf32> to vector<16x128xbf16>
    %c0_46 = arith.constant 0 : index
    %c0_47 = arith.constant 0 : index
    %c0_48 = arith.constant 0 : index
    %163 = vector.load %arg5[%c0_46, %c0_47, %c0_48] : memref<1x384x256xbf16, #tpu.memory_space<vmem>>, vector<1x128x256xbf16>
    %164 = vector.shape_cast %163 : vector<1x128x256xbf16> to vector<128x256xbf16>
    %cst_49 = arith.constant dense<0.000000e+00> : vector<16x256xf32>
    %165 = tpu.matmul %162, %164, %cst_49 {dimension_numbers = #tpu.dot_dimension_numbers<[1], [0], [0], [1], [0, 0, 1, 1], [], []>} : vector<16x128xbf16>, vector<128x256xbf16>, vector<16x256xf32> -> vector<16x256xf32>
    %166 = vector.broadcast %32 : vector<1x256xf32> to vector<16x256xf32>
    %167 = arith.addf %165, %166 : vector<16x256xf32>
    %cst_50 = arith.constant 0.000000e+00 : f32
    %168 = vector.broadcast %cst_50 : f32 to vector<16x256xf32>
    %169 = arith.maximumf %167, %168 : vector<16x256xf32>
    %170 = arith.truncf %169 : vector<16x256xf32> to vector<16x256xbf16>
    %c0_51 = arith.constant 0 : index
    %c128 = arith.constant 128 : index
    %c0_52 = arith.constant 0 : index
    %171 = vector.load %arg5[%c0_51, %c128, %c0_52] : memref<1x384x256xbf16, #tpu.memory_space<vmem>>, vector<1x256x128xbf16>
    %172 = vector.shape_cast %171 : vector<1x256x128xbf16> to vector<256x128xbf16>
    %cst_53 = arith.constant dense<0.000000e+00> : vector<16x128xf32>
    %173 = tpu.matmul %170, %172, %cst_53 {dimension_numbers = #tpu.dot_dimension_numbers<[1], [0], [0], [1], [0, 0, 1, 1], [], []>} : vector<16x256xbf16>, vector<256x128xbf16>, vector<16x128xf32> -> vector<16x128xf32>
    %174 = vector.broadcast %33 : vector<1x128xf32> to vector<16x128xf32>
    %175 = arith.addf %173, %174 : vector<16x128xf32>
    %176 = arith.addf %175, %161 : vector<16x128xf32>
    %cst_54 = arith.constant dense<0.000000e+00> : vector<16xf32>
    %177 = vector.multi_reduction <add>, %176, %cst_54 [1] : vector<16x128xf32> to vector<16xf32>
    %178 = vector.shape_cast %177 : vector<16xf32> to vector<16x1xf32>
    %cst_55 = arith.constant 1.280000e+02 : f32
    %179 = vector.broadcast %cst_55 : f32 to vector<16x1xf32>
    %180 = arith.divf %178, %179 : vector<16x1xf32>
    %181 = arith.mulf %176, %176 : vector<16x128xf32>
    %cst_56 = arith.constant dense<0.000000e+00> : vector<16xf32>
    %182 = vector.multi_reduction <add>, %181, %cst_56 [1] : vector<16x128xf32> to vector<16xf32>
    %183 = vector.shape_cast %182 : vector<16xf32> to vector<16x1xf32>
    %cst_57 = arith.constant 1.280000e+02 : f32
    %184 = vector.broadcast %cst_57 : f32 to vector<16x1xf32>
    %185 = arith.divf %183, %184 : vector<16x1xf32>
    %186 = arith.mulf %180, %180 : vector<16x1xf32>
    %187 = arith.subf %185, %186 : vector<16x1xf32>
    %188 = vector.broadcast %180 : vector<16x1xf32> to vector<16x128xf32>
    %189 = arith.subf %176, %188 : vector<16x128xf32>
    %cst_58 = arith.constant 9.99999974E-6 : f32
    %190 = vector.broadcast %cst_58 : f32 to vector<16x1xf32>
    %191 = arith.addf %187, %190 : vector<16x1xf32>
    %192 = math.rsqrt %191 : vector<16x1xf32>
    %193 = vector.broadcast %192 : vector<16x1xf32> to vector<16x128xf32>
    %194 = arith.mulf %189, %193 : vector<16x128xf32>
    %195 = vector.broadcast %36 : vector<1x128xf32> to vector<16x128xf32>
    %196 = arith.mulf %194, %195 : vector<16x128xf32>
    %197 = vector.broadcast %37 : vector<1x128xf32> to vector<16x128xf32>
    %198 = arith.addf %196, %197 : vector<16x128xf32>
    %c0_59 = arith.constant 0 : index
    %c0_60 = arith.constant 0 : index
    %199 = vector.load %arg7[%c0_59, %c0_60] : memref<16x128xf32, #tpu.memory_space<vmem>>, vector<16x128xf32>
    tpu.vector_store %arg7[%c0_59, %c0_60], %198 {strides = array<i32>} : memref<16x128xf32, #tpu.memory_space<vmem>>, vector<16x128xf32>,
    return
  }
  func.func @transform_1(%arg0: i32) -> (i32, i32) {
    %c0_i32 = arith.constant 0 : i32
    %c0_i32_0 = arith.constant 0 : i32
    %c0_i32_1 = arith.constant 0 : i32
    return %c0_i32, %c0_i32_0 : i32, i32
  }
  func.func @transform_2(%arg0: i32) -> (i32, i32, i32) {
    %c0_i32 = arith.constant 0 : i32
    %c0_i32_0 = arith.constant 0 : i32
    %c0_i32_1 = arith.constant 0 : i32
    return %arg0, %c0_i32, %c0_i32_0 : i32, i32, i32
  }
  func.func @transform_3(%arg0: i32) -> (i32, i32, i32) {
    %c0_i32 = arith.constant 0 : i32
    %c0_i32_0 = arith.constant 0 : i32
    %c0_i32_1 = arith.constant 0 : i32
    return %arg0, %c0_i32, %c0_i32_0 : i32, i32, i32
  }
  func.func @transform_4(%arg0: i32) -> (i32, i32, i32) {
    %c0_i32 = arith.constant 0 : i32
    %c0_i32_0 = arith.constant 0 : i32
    %c0_i32_1 = arith.constant 0 : i32
    return %arg0, %c0_i32, %c0_i32_0 : i32, i32, i32
  }
  func.func @transform_5(%arg0: i32) -> (i32, i32, i32) {
    %c0_i32 = arith.constant 0 : i32
    %c0_i32_0 = arith.constant 0 : i32
    %c0_i32_1 = arith.constant 0 : i32
    return %arg0, %c0_i32, %c0_i32_0 : i32, i32, i32
  }
  func.func @transform_6(%arg0: i32) -> (i32, i32) {
    %c0_i32 = arith.constant 0 : i32
    %c0_i32_0 = arith.constant 0 : i32
    %c0_i32_1 = arith.constant 0 : i32
    return %c0_i32, %c0_i32_0 : i32, i32
  }
}

</mosaic_0001>

<bundles_post_ra>
// kernel: _lambda_.1
= control target key start
LH: loop header
LB: loop body
LE: loop exit
PB: predicated region body
PF: predicated region fallthrough
CT: control target
= control target key end

     0   :  { %11 = vsyncpa [#allocation4], 0  ;;  %s2240_s21 = smov 0   ;;  %s2559_s0 = inlined_call_operand.vmem [shape: f32[16,128], index: 0, kind: input, shape index: {}]   ;;  %s2560_s1 = inlined_call_operand.vmem [shape: f32[1,16], index: 1, kind: input, shape index: {}]   ;;  %s2561_s2 = inlined_call_operand.vmem [shape: bf16[2,128,384], index: 2, kind: input, shape index: {}]   ;;  %s2562_s3 = inlined_call_operand.vmem [shape: bf16[2,128,128], index: 3, kind: input, shape index: {}]   ;;  %s2563_s4 = inlined_call_operand.vmem [shape: bf16[2,384,256], index: 4, kind: input, shape index: {}]   ;;  %s2564_s5 = inlined_call_operand.vmem [shape: f32[2,8,384], index: 5, kind: input, shape index: {}]   ;;  %s2565_s6 = inlined_call_operand.hbm [shape: f32[16,128], index: 6, kind: output, shape index: {}]  }
   0x1 LB: > { %s2246_s22 = sadd.s32 4294967295, %s2193_s21   ;;  %p1766_p0 = scmp.ge.s32.totalorder %s2193_s21, 1  ;;  %s2193_s21 = sphi %s2240_s21, %s17_s21  }
   0x2   : > { %p214_p1 = scmp.lt.s32.totalorder %s2193_s21, 3 }
   0x4   : > { %p215_p2 = pnand %p1766_p0, %p214_p1 }
   0x5   : > { %p252_p3 = scmp.lt.s32.totalorder (!%p215_p2), %s2246_s22, 1  ;;  %p1772_p4 = scmp.ne.s32.totalorder (!%p215_p2), %s2246_s22, 0 }
   0x6   : > { %218 = sbr.rel (%p215_p2) target bundleno = 2607 (0xa2f), region = 40 }
   0xb   : > { %s253_s23 = scalar_select %p252_p3, %s2246_s22, 1 }
   0xd   : > { %s1995_s24 = smul.u32 192, %s253_s23  ;;  %s1850_s25 = sshll.u32 %s253_s23, 6 }
   0xe   : > { %s2255_s28 = scalar_lea.vmem %s2562_s3, %s1850_s25  ;;  %s1996_s29 = smul.u32 384, %s253_s23 }
   0xf   : > { %s2260_s8 = scalar_lea.vmem %s2561_s2, %s1995_s24  ;;  %s1997_s9 = smul.u32 24, %s253_s23 }
  0x10   : > { %s2265_s12 = scalar_lea.vmem %s2563_s4, %s1996_s29  ;;  %276 = sbr.rel (%p1772_p4) target bundleno = 26 (0x1a), region = 44 }
  0x11   : > { %s2270_s15 = scalar_lea.vmem %s2564_s5, %s1997_s9 }
  0x15   : > { %v310_v0 = vld [vmem:[%s2559_s0] sm:$0xff]  ;;  %v312_v1 = vld [vmem:[%s2559_s0 + $0x8] sm:$0xff] }
  0x16   : > { %311 = vst [vmem:[#allocation3] sm:$0xff] %v310_v0  ;;  %313 = vst [vmem:[#allocation3 + $0x8] sm:$0xff] %v312_v1 }
  0x17   : > { %321 = vsyncadd [#allocation2], 256 }
  0x18   : > { %2185 = dma.done.wait [#allocation2], 256 }
  0x19   : > { %2186 = vsyncadd [#allocation2], 4294967040 }
  0x1a PF: > { %v2037_v2 = vld [vmem:[%s2260_s8 + $0xac] ss:$12 sps:$4 sm:$0xff]   ;;  %v2039_v3 = vld [vmem:[%s2260_s8 + $0xa8] ss:$12 sps:$4 sm:$0xff]   ;;  %v2195_v4 = vmov 0   ;;  %v2196_v5 = vmov 0.0   ;;  %v328_v31 = vlaneseq }
  0x1b   : > { %566 = vmatprep.mubr.bf16.mxu0 %v2195_v4  ;;  %1907 = vmatprep.subr.bf16.mxu1 %v2196_v5  ;;  %v2040_v6 = vld [vmem:[%s2260_s8 + $0x94] ss:$12 sps:$4 sm:$0xff]   ;;  %v2042_v7 = vld [vmem:[%s2260_s8 + $0x90] ss:$12 sps:$4 sm:$0xff]   ;;  %v2045_v9 = vld [vmem:[%s2260_s8 + $0x78] ss:$12 sps:$4 sm:$0xff]  }
  0x1c   : > { %534 = vmatprep.subr.bf16.mxu0 %v2037_v2  ;;  %v2043_v8 = vld [vmem:[%s2260_s8 + $0x7c] ss:$12 sps:$4 sm:$0xff]   ;;  %v2046_v10 = vld [vmem:[%s2260_s8 + $0x64] ss:$12 sps:$4 sm:$0xff]   ;;  %v2048_v11 = vld [vmem:[%s2260_s8 + $0x60] ss:$12 sps:$4 sm:$0xff]  }
  0x1d   : > { %535 = vmatpush1.bf16.msra.mxu0 %v2039_v3  ;;  %v2049_v12 = vld [vmem:[%s2260_s8 + $0x4c] ss:$12 sps:$4 sm:$0xff]   ;;  %v2061_v13 = vld [vmem:[%s2260_s8 + $0xb0] ss:$12 sps:$4 sm:$0xff]   ;;  %v2051_v14 = vld [vmem:[%s2260_s8 + $0x48] ss:$12 sps:$4 sm:$0xff]  }
  0x1e   : > { %536 = vmatprep.subr.bf16.mxu0 %v2040_v6  ;;  %1908 = vmatpush3.bf16.msra.mxu1 %v2061_v13  ;;  %v2062_v15 = vld [vmem:[%s2260_s8 + $0x98] ss:$12 sps:$4 sm:$0xff]   ;;  %v2052_v16 = vld [vmem:[%s2260_s8 + $0x34] ss:$12 sps:$4 sm:$0xff]   ;;  %v2054_v17 = vld [vmem:[%s2260_s8 + $0x30] ss:$12 sps:$4 sm:$0xff]  }
  0x1f   : > { %1909 = vmatprep.subr.bf16.mxu1 %v2196_v5  ;;  %v2063_v18 = vld [vmem:[%s2260_s8 + $0x80] ss:$12 sps:$4 sm:$0xff]   ;;  %v2055_v19 = vld [vmem:[%s2260_s8 + $0x1c] ss:$12 sps:$4 sm:$0xff]   ;;  %v2057_v21 = vld [vmem:[%s2260_s8 + $0x18] ss:$12 sps:$4 sm:$0xff]  }
  0x20   : > { %v2064_v20 = vld [vmem:[%s2260_s8 + $0x68] ss:$12 sps:$4 sm:$0xff]   ;;  %v2058_v22 = vld [vmem:[%s2260_s8 + $0x4] ss:$12 sps:$4 sm:$0xff]   ;;  %v2060_v24 = vld [vmem:[%s2260_s8] ss:$12 sps:$4 sm:$0xff]  }
  0x21   : > { %537 = vmatpush1.bf16.msra.mxu0 %v2042_v7  ;;  %v2065_v23 = vld [vmem:[%s2260_s8 + $0x50] ss:$12 sps:$4 sm:$0xff]   ;;  %v2305_v25 = vld [vmem:[#allocation3] sm:$0xff]  ;;  %v2307_v26 = vld [vmem:[#allocation3 + $0x8] sm:$0xff]  ;;  %vm2197_vm0 = vmmov 0   ;;  %v2326_v32 = vshrl.u32 %v328_v31, 7 }
  0x22   : > { %538 = vmatprep.subr.bf16.mxu0 %v2043_v8  ;;  %1910 = vmatpush3.bf16.msra.mxu1 %v2062_v15  ;;  %v2066_v27 = vld [vmem:[%s2260_s8 + $0x38] ss:$12 sps:$4 sm:$0xff]   ;;  %v361_v28 = vpack.c.bf16 %v2307_v26, %v2305_v25  ;;  %v2067_v29 = vld [vmem:[%s2260_s8 + $0x20] ss:$12 sps:$4 sm:$0xff]   ;;  %v2068_v30 = vld [vmem:[%s2260_s8 + $0x8] ss:$12 sps:$4 sm:$0xff]  }
  0x23   : > { %1911 = vmatprep.subr.bf16.mxu1 %v2196_v5  ;;  %1923 = vmatprep.mubr.msk.bf16.mxu1 %vm2197_vm0, %v2196_v5  ;;  %v2329_v34 = vld [vmem:[%s2270_s15 + $0x8] sm:$0xff]  ;;  %v351_v35 = vsub.s32 0, %v2326_v32  ;;  %v2334_v38 = vld [vmem:[%s2270_s15] sm:$0xff]  ;;  %vm623_vm1 = vcmask 261120   ;;  %v360_v51 = vld [vmem:[%s2270_s15 + $0x10] sm:$0xff]  ;;  %v334_v60 = vand.u32 127, %v328_v31  ;;  %v331_v61 = vcvt.s32.f32 %v2326_v32 }
  0x24   : > { %v330_v63 = vadd.s32 8, %v2326_v32  ;;  %v327_v0 = vld [vmem:[%s2560_s1] sm:$0x1]  ;;  %vm673_vm6 = vcmask 130048   ;;  %s2199_s24 = smov 96   ;;  %s2200_s25 = smov 32  }
  0x25   : > { %539 = vmatpush1.bf16.msra.mxu0 %v2045_v9  ;;  %v401_v37 = vrot.slane %v2329_v34, %v351_v35  ;;  %v397_v41 = vrot.slane %v2334_v38, %v351_v35  ;;  %v405_v52 = vrot.slane %v360_v51, %v351_v35  ;;  %v335_v62 = vcvt.s32.f32 %v334_v60  ;;  %s2201_s26 = smov 64   ;;  %s2202_s27 = smov [#allocation3]  }
  0x26   : > { %540 = vmatprep.subr.bf16.mxu0 %v2046_v10  ;;  %1912 = vmatpush3.bf16.msra.mxu1 %v2063_v18  ;;  %v336_v1 = vadd.f32 0.5, %v331_v61  ;;  %v332_v3 = vcvt.s32.f32 %v330_v63  ;;  %vm347_vm2 = vcmp.gt.f32.partialorder %v327_v0, 0.5  ;;  %vm1139_vm9 = vcmask 523264   ;;  %p2002_p5 = scmp.eq.s32.totalorder %s2246_s22, 1 }
  0x27   : > { %1913 = vmatprep.subr.bf16.mxu1 %v2196_v5  ;;  %v342_v2 = vadd.f32 0.5, %v335_v62  ;;  %v348_v9 = vsel %vm347_vm2, 1, %v2195_v4  ;;  %vm1142_vm10 = vcmask 785408  }
  0x28   : > { %v338_v6 = vmul.f32 0.125, %v336_v1  ;;  %v337_v8 = vadd.f32 0.5, %v332_v3  ;;  %v352_v10 = vrot.slane %v348_v9, %v351_v35 }
  0x29   : > { %541 = vmatpush1.bf16.msra.mxu0 %v2048_v11  ;;  %v343_v7 = vmul.f32 0.125, %v342_v2 }
  0x2a   : > { %542 = vmatprep.subr.bf16.mxu0 %v2049_v12  ;;  %1914 = vmatpush3.bf16.msra.mxu1 %v2064_v20  ;;  %v340_v11 = vfloor.f32 %v338_v6  ;;  %v339_v13 = vmul.f32 0.125, %v337_v8  ;;  %vm353_vm3 = vcmp.eq.s32.totalorder %v352_v10, 1 }
  0x2b   : > { %1915 = vmatprep.subr.bf16.mxu1 %v2196_v5  ;;  %v344_v12 = vfloor.f32 %v343_v7 }
  0x2d   : > { %543 = vmatpush1.bf16.msra.mxu0 %v2051_v14  ;;  %vm345_vm4 = vcmp.ne.f32.partialorder %v340_v11, %v344_v12  ;;  %v341_v14 = vfloor.f32 %v339_v13 }
  0x2e   : > { %544 = vmatprep.subr.bf16.mxu0 %v2052_v16  ;;  %1916 = vmatpush3.bf16.msra.mxu1 %v2065_v23  ;;  %vm2359_vm5 = vmor %vm345_vm4, %vm353_vm3  ;;  %v2198_v16 = vmov -1e+09  }
  0x2f   : > { %1917 = vmatprep.subr.bf16.mxu1 %v2196_v5  ;;  %vm346_vm7 = vcmp.ne.f32.partialorder %v341_v14, %v344_v12 }
  0x30   : > { %vm2369_vm8 = vmor %vm346_vm7, %vm353_vm3  ;;  %v2373_v23 = vsel %vm346_vm7, -2e+09, %v2198_v16 }
  0x31   : > { %545 = vmatpush1.bf16.msra.mxu0 %v2054_v17  ;;  %v2363_v17 = vsel %vm345_vm4, -2e+09, %v2198_v16 }
  0x32   : > { %546 = vmatprep.subr.bf16.mxu0 %v2055_v19  ;;  %1918 = vmatpush3.bf16.msra.mxu1 %v2066_v27 }
  0x33   : > { %1919 = vmatprep.subr.bf16.mxu1 %v2196_v5 }
  0x35   : > { %547 = vmatpush1.bf16.msra.mxu0 %v2057_v21 }
  0x36   : > { %548 = vmatprep.subr.bf16.mxu0 %v2058_v22  ;;  %1920 = vmatpush3.bf16.msra.mxu1 %v2067_v29 }
  0x37   : > { %1921 = vmatprep.subr.bf16.mxu1 %v2196_v5 }
  0x39   : > { %549 = vmatpush1.bf16.msra.mxu0 %v2060_v24 }
  0x3a   : > { %1951 = vmatprep.subr.bf16.mxu0 %v2196_v5  ;;  %1922 = vmatpush3.bf16.msra.mxu1 %v2068_v30 }
  0x3b   : > { %1927 = vmatprep.subr.bf16.mxu1 %v2196_v5 }
  0x3c   : > { %567 = vmatmul.mubr.bf16.vlgmr.msra.gmra.mxu0 %v361_v28 }
  0x3d   : > { %1953 = vmatprep.mubr.msk.bf16.mxu0 %vm2197_vm0, %v2196_v5  ;;  %1924 = vmatmul.mubr.bf16.vlgmr.msra.gmra.mxu1 %v361_v28 }
  0x3e   : > { %1929 = vmatprep.mubr.msk.bf16.mxu1 %vm2197_vm0, %v2196_v5 }
  0xfc   : > { %v568_v33 = vpop.f32.mrf.mxu0 }
  0xfd   : > { %v569_v46 = vadd.f32 %v568_v33, %v397_v41  ;;  %v611_v53 = vpop.f32.mrf.mxu1 }
  0xfe   : > { %v570_v36 = vpop.f32.mrf.mxu0  ;;  %v612_v55 = vadd.f32 %v611_v53, %v405_v52 }
  0xff   : > { %v571_v42 = vadd.f32 %v570_v36, %v401_v37  ;;  %v619_v49 = vmul.f32 0.17677669, %v569_v46  ;;  %v1925_v54 = vpop.f32.mrf.mxu1 }
 0x100   : > { %v572_v39 = vpop.f32.mrf.mxu0 }
 0x101   : > { %v573_v44 = vadd.f32 %v572_v39, %v397_v41  ;;  %v614_v56 = vpop.f32.mrf.mxu1 }
 0x102   : > { %v574_v40 = vpop.f32.mrf.mxu0  ;;  %v615_v57 = vadd.f32 %v614_v56, %v405_v52 }
 0x103   : > { %v575_v43 = vadd.f32 %v574_v40, %v401_v37  ;;  %v620_v48 = vmul.f32 0.17677669, %v573_v44  ;;  %v1926_v58 = vpop.f32.mrf.mxu1 }
 0x104   : > { %v2349_v59 = vpack.c.bf16 %v615_v57, %v612_v55 }
 0x105   : > { %v2337_v45 = vpack.c.bf16 %v575_v43, %v571_v42  ;;  %v2342_v50 = vpack.c.bf16 %v620_v48, %v619_v49 }
 0x107   : > { %v628_v47 = vsel %vm623_vm1, %v2337_v45, 0 }
 0x108   : > { %1928 = vmatpush3.bf16.xpose.msra.mxu1 %v628_v47 }
 0x109   : > { %1933 = vmatprep.subr.bf16.mxu1 %v2196_v5 }
 0x10f   : > { %1930 = vmatmul.mubr.msk.bf16.vlgmr.msra.gmra.mxu1 %vm623_vm1, %v2342_v50 }
 0x110   : > { %1935 = vmatprep.mubr.msk.bf16.mxu1 %vm2197_vm0, %v2196_v5  ;;  %1934 = vmatpush3.bf16.msra.mxu1 %v2349_v59 }
 0x111   : > { %1939 = vmatprep.subr.bf16.mxu1 %v2196_v5 }
 0x1cf   : > { %v664_v18 = vpop.f32.mrf.mxu1 }
 0x1d0   : > { %v671_v19 = vsel %vm2359_vm5, %v2363_v17, %v664_v18 }
 0x1d1   : > { %v1931_v20 = vpop.f32.mrf.mxu1  ;;  %v674_v21 = vsel %vm673_vm6, %v671_v19, -inf }
 0x1d2   : > { %675 = vmax.xlane.f32.xlu0 %v674_v21 }
 0x1d3   : > { %v667_v24 = vpop.f32.mrf.mxu1 }
 0x1d4   : > { %v672_v27 = vsel %vm2369_vm8, %v2373_v23, %v667_v24 }
 0x1d5   : > { %v1932_v28 = vpop.f32.mrf.mxu1  ;;  %v677_v29 = vsel %vm673_vm6, %v672_v27, -inf }
 0x1d6   : > { %678 = vmax.xlane.f32.xlu0 %v677_v29 }
 0x1ec   : > { %745 = vrot.lane.b32.xlu0 %v2337_v45, %s2199_s24 }
 0x1f0   : > { %992 = vrot.lane.b32.xlu0 %v2337_v45, %s2200_s25 }
 0x25b   : > { %v676_v30 = vpop.xlane.xlu0 %675 }
 0x25c   : > { %v680_v31 = vsub.f32 %v671_v19, %v676_v30 }
 0x25e   : > { %v682_v33 = vmul.f32 1.442695, %v680_v31 }
 0x25f   : > { %v679_v35 = vpop.xlane.xlu0 %678 }
 0x260   : > { %2117 = vpow2.f32 %v682_v33  ;;  %v681_v36 = vsub.f32 %v672_v27, %v679_v35 }
 0x262   : > { %v684_v37 = vmul.f32 1.442695, %v681_v36 }
 0x263   : > { %v746_v47 = vpop.permute.xlu0 %745 }
 0x264   : > { %2119 = vpow2.f32 %v684_v37  ;;  %v751_v57 = vsel %vm623_vm1, %v746_v47, 0 }
 0x267   : > { %v993_v52 = vpop.permute.xlu0 %992 }
 0x26d   : > { %v2118_v39 = vpop.eup %2117 }
 0x26e   : > { %v686_v40 = vsel %vm673_vm6, %v2118_v39, 0.0 }
 0x26f   : > { %687 = vadd.xlane.f32.xlu1 %v686_v40 }
 0x271   : > { %v2120_v41 = vpop.eup %2119 }
 0x272   : > { %v689_v42 = vsel %vm673_vm6, %v2120_v41, 0.0 }
 0x273   : > { %690 = vadd.xlane.f32.xlu1 %v689_v42 }
 0x284   : > { %742 = vrot.lane.b32.xlu1 %v2342_v50, %s2199_s24 }
 0x288   : > { %869 = vrot.lane.b32.xlu1 %v2337_v45, %s2201_s26 }
 0x28c   : > { %867 = vrot.lane.b32.xlu1 %v2342_v50, %s2201_s26 }
 0x290   : > { %990 = vrot.lane.b32.xlu1 %v2342_v50, %s2200_s25  ;;  %v998_v50 = vsel %vm623_vm1, %v993_v52, 0 }
 0x2f8   : > { %v688_v43 = vpop.xlane.xlu1 %687 }
 0x2f9   : > { %2121 = vrcp.f32 %v688_v43 }
 0x2fc   : > { %v691_v44 = vpop.xlane.xlu1 %690 }
 0x2fd   : > { %2123 = vrcp.f32 %v691_v44 }
 0x300   : > { %v743_v46 = vpop.permute.xlu1 %742 }
 0x304   : > { %v870_v48 = vpop.permute.xlu1 %869 }
 0x305   : > { %v875_v49 = vsel %vm623_vm1, %v870_v48, 0 }
 0x306   : > { %1952 = vmatpush3.bf16.xpose.msra.mxu0 %v875_v49  ;;  %v2122_v51 = vpop.eup %2121 }
 0x307   : > { %1963 = vmatprep.subr.bf16.mxu0 %v2196_v5  ;;  %v694_v53 = vmul.f32 %v2122_v51, %v2118_v39 }
 0x308   : > { %v868_v55 = vpop.permute.xlu1 %867 }
 0x30a   : > { %v2124_v45 = vpop.eup %2123 }
 0x30b   : > { %v695_v54 = vmul.f32 %v2124_v45, %v2120_v41 }
 0x30c   : > { %v991_v58 = vpop.permute.xlu1 %990 }
 0x30d   : > { %1954 = vmatmul.mubr.msk.bf16.vlgmr.msra.gmra.mxu0 %vm623_vm1, %v868_v55  ;;  %v696_v56 = vpack.c.bf16 %v695_v54, %v694_v53 }
 0x30e   : > { %1964 = vmatpush3.bf16.xpose.msra.mxu0 %v998_v50  ;;  %1965 = vmatprep.mubr.msk.bf16.mxu0 %vm2197_vm0, %v2196_v5 }
 0x30f   : > { %1936 = vmatmul.mubr.msk.bf16.vlgmr.msra.gmra.mxu1 %vm673_vm6, %v696_v56  ;;  %1975 = vmatprep.subr.bf16.mxu0 %v2196_v5 }
 0x310   : > { %1940 = vmatpush3.bf16.xpose.msra.mxu1 %v751_v57  ;;  %1941 = vmatprep.mubr.msk.bf16.mxu1 %vm2197_vm0, %v2196_v5 }
 0x311   : > { %1945 = vmatprep.subr.bf16.mxu1 %v2196_v5 }
 0x315   : > { %1966 = vmatmul.mubr.msk.bf16.vlgmr.msra.gmra.mxu0 %vm623_vm1, %v991_v58 }
 0x316   : > { %1991 = vmatprep.mubr.msk.bf16.mxu0 %vm2197_vm0, %v2196_v5 }
 0x317   : > { %1942 = vmatmul.mubr.msk.bf16.vlgmr.msra.gmra.mxu1 %vm623_vm1, %v743_v46 }
 0x318   : > { %1947 = vmatprep.mubr.msk.bf16.mxu1 %vm2197_vm0, %v2196_v5 }
 0x3cd   : > { %v911_v60 = vpop.f32.mrf.mxu0 }
 0x3ce   : > { %v918_v13 = vsel %vm2359_vm5, %v2363_v17, %v911_v60 }
 0x3cf   : > { %v2411_v61 = vpop.f32.mrf.mxu1  ;;  %v1955_v62 = vpop.f32.mrf.mxu0  ;;  %v920_v20 = vsel %vm673_vm6, %v918_v13, -inf }
 0x3d1   : > { %v1937_v63 = vpop.f32.mrf.mxu1  ;;  %v914_v0 = vpop.f32.mrf.mxu0 }
 0x3d2   : > { %v919_v24 = vsel %vm2369_vm8, %v2373_v23, %v914_v0 }
 0x3d3   : > { %v2413_v1 = vpop.f32.mrf.mxu1  ;;  %v1956_v2 = vpop.f32.mrf.mxu0  ;;  %v923_v28 = vsel %vm673_vm6, %v919_v24, -inf }
 0x3d5   : > { %v1938_v3 = vpop.f32.mrf.mxu1  ;;  %v1034_v6 = vpop.f32.mrf.mxu0 }
 0x3d6   : > { %v1041_v30 = vsel %vm2359_vm5, %v2363_v17, %v1034_v6 }
 0x3d7   : > { %v787_v7 = vpop.f32.mrf.mxu1  ;;  %v1967_v8 = vpop.f32.mrf.mxu0  ;;  %v1043_v31 = vsel %vm673_vm6, %v1041_v30, -inf }
 0x3d8   : > { %v794_v9 = vsel %vm2359_vm5, %v2363_v17, %v787_v7 }
 0x3d9   : > { %v1943_v10 = vpop.f32.mrf.mxu1  ;;  %v1037_v11 = vpop.f32.mrf.mxu0  ;;  %v796_v12 = vsel %vm673_vm6, %v794_v9, -inf }
 0x3da   : > { %797 = vmax.xlane.f32.xlu0 %v796_v12  ;;  %v1042_v27 = vsel %vm2369_vm8, %v2373_v23, %v1037_v11 }
 0x3db   : > { %v790_v14 = vpop.f32.mrf.mxu1  ;;  %v1968_v16 = vpop.f32.mrf.mxu0  ;;  %v1046_v29 = vsel %vm673_vm6, %v1042_v27, -inf }
 0x3dc   : > { %v795_v18 = vsel %vm2369_vm8, %v2373_v23, %v790_v14 }
 0x3dd   : > { %v1944_v19 = vpop.f32.mrf.mxu1  ;;  %v799_v21 = vsel %vm673_vm6, %v795_v18, -inf }
 0x3de   : > { %921 = vmax.xlane.f32.xlu0 %v920_v20  ;;  %800 = vmax.xlane.f32.xlu1 %v799_v21 }
 0x3e2   : > { %924 = vmax.xlane.f32.xlu0 %v923_v28  ;;  %1047 = vmax.xlane.f32.xlu1 %v1046_v29 }
 0x3e6   : > { %1044 = vmax.xlane.f32.xlu0 %v1043_v31  ;;  %v2069_v31 = vld [vmem:[%s2255_s28 + $0x38] sm:$0xff]  }
 0x3e7   : > { %1976 = vmatpush3.bf16.msra.mxu0 %v2069_v31  ;;  %v2094_v31 = vld [vmem:[%s2265_s12 + $0x24] ss:$8 sps:$4 sm:$0xff]  }
 0x3e8   : > { %1977 = vmatprep.subr.bf16.mxu0 %v2196_v5 }
 0x463   : > { %v798_v33 = vpop.xlane.xlu0 %797 }
 0x464   : > { %v802_v42 = vsub.f32 %v794_v9, %v798_v33  ;;  %v2070_v33 = vld [vmem:[%s2255_s28 + $0x30] sm:$0xff]  }
 0x465   : > { %1978 = vmatpush3.bf16.msra.mxu0 %v2070_v33  ;;  %v2092_v33 = vld [vmem:[%s2265_s12 + $0x20] ss:$8 sps:$4 sm:$0xff]  }
 0x466   : > { %v804_v17 = vmul.f32 1.442695, %v802_v42  ;;  %1979 = vmatprep.subr.bf16.mxu0 %v2196_v5 }
 0x467   : > { %v922_v35 = vpop.xlane.xlu0 %921  ;;  %v801_v36 = vpop.xlane.xlu1 %800 }
 0x468   : > { %v926_v37 = vsub.f32 %v918_v13, %v922_v35  ;;  %v803_v43 = vsub.f32 %v795_v18, %v801_v36  ;;  %v2071_v35 = vld [vmem:[%s2255_s28 + $0x28] sm:$0xff]   ;;  %v2072_v36 = vld [vmem:[%s2255_s28 + $0x20] sm:$0xff]  }
 0x469   : > { %1980 = vmatpush3.bf16.msra.mxu0 %v2071_v35  ;;  %v2097_v35 = vld [vmem:[%s2265_s12 + $0x14] ss:$8 sps:$4 sm:$0xff]  }
 0x46a   : > { %v928_v39 = vmul.f32 1.442695, %v926_v37  ;;  %v806_v48 = vmul.f32 1.442695, %v803_v43  ;;  %1981 = vmatprep.subr.bf16.mxu0 %v2196_v5  ;;  %v2073_v37 = vld [vmem:[%s2255_s28 + $0x18] sm:$0xff]  }
 0x46b   : > { %v925_v22 = vpop.xlane.xlu0 %924  ;;  %v1048_v23 = vpop.xlane.xlu1 %1047 }
 0x46c   : > { %2125 = vpow2.f32 %v928_v39  ;;  %v927_v40 = vsub.f32 %v919_v24, %v925_v22  ;;  %v1050_v41 = vsub.f32 %v1042_v27, %v1048_v23  ;;  %v2074_v22 = vld [vmem:[%s2255_s28 + $0x10] sm:$0xff]  }
 0x46d   : > { %1982 = vmatpush3.bf16.msra.mxu0 %v2072_v36  ;;  %v2095_v36 = vld [vmem:[%s2265_s12 + $0x10] ss:$8 sps:$4 sm:$0xff]  }
 0x46e   : > { %v930_v44 = vmul.f32 1.442695, %v927_v40  ;;  %v1053_v46 = vmul.f32 1.442695, %v1050_v41  ;;  %1983 = vmatprep.subr.bf16.mxu0 %v2196_v5  ;;  %v2075_v41 = vld [vmem:[%s2255_s28 + $0x8] sm:$0xff]  }
 0x46f   : > { %v1045_v47 = vpop.xlane.xlu0 %1044 }
 0x470   : > { %2127 = vpow2.f32 %v930_v44  ;;  %v1049_v15 = vsub.f32 %v1041_v30, %v1045_v47 }
 0x471   : > { %2129 = vpow2.f32 %v1053_v46  ;;  %1984 = vmatpush3.bf16.msra.mxu0 %v2073_v37  ;;  %v2076_v46 = vld [vmem:[%s2255_s28] sm:$0xff]   ;;  %s1671_s28 = sshll.u32 %s2202_s27, 4  ;;  %s1672_s28 = int_to_ptr.vmem [resolvable:$true] %s1671_s28 }
 0x472   : > { %v1051_v49 = vmul.f32 1.442695, %v1049_v15  ;;  %1985 = vmatprep.subr.bf16.mxu0 %v2196_v5  ;;  %v2100_v37 = vld [vmem:[%s2265_s12 + $0x4] ss:$8 sps:$4 sm:$0xff]   ;;  %s2157_s29 = scalar_lea.vmem %s1672_s28, 256  ;;  %p2164_p9 = scmp.lt.s32.totalorder %s1672_s28, %s1672_s28 }
 0x473   : > { %p2158_p6 = scmp.ne.s32.totalorder %s1672_s28, %s2157_s29  ;;  %p2165_p10 = scmp.lt.s32.totalorder %s2157_s29, %s2157_s29 }
 0x474   : > { %2131 = vpow2.f32 %v1051_v49 }
 0x475   : > { %2133 = vpow2.f32 %v804_v17  ;;  %1986 = vmatpush3.bf16.msra.mxu0 %v2074_v22  ;;  %v2102_v22 = vld [vmem:[%s2265_s12 + $0xf0] ss:$8 sps:$4 sm:$0xff]   ;;  %p2159_p7 = pnand %p2158_p6, %p2002_p5  ;;  %p2166_p11 = por %p2165_p10, %p2164_p9 }
 0x476   : > { %2135 = vpow2.f32 %v806_v48  ;;  %1987 = vmatprep.subr.bf16.mxu0 %v2196_v5 }
 0x477   : > { %p2160_p8 = pneg %p2159_p7 }
 0x479   : > { %v2126_v51 = vpop.eup %2125  ;;  %1988 = vmatpush3.bf16.msra.mxu0 %v2075_v41  ;;  %v2105_v41 = vld [vmem:[%s2265_s12 + $0x150] ss:$8 sps:$4 sm:$0xff]   ;;  %p2167_p12 = pnand %p2166_p11, %p2160_p8 }
 0x47a   : > { %v932_v45 = vsel %vm673_vm6, %v2126_v51, 0.0  ;;  %1989 = vmatprep.subr.bf16.mxu0 %v2196_v5 }
 0x47b   : > { %933 = vadd.xlane.f32.xlu0 %v932_v45 }
 0x47d   : > { %v2128_v52 = vpop.eup %2127  ;;  %1990 = vmatpush3.bf16.msra.mxu0 %v2076_v46  ;;  %v2109_v46 = vld [vmem:[%s2265_s12 + $0x130] ss:$8 sps:$4 sm:$0xff]  }
 0x47e   : > { %v935_v53 = vsel %vm673_vm6, %v2128_v52, 0.0  ;;  %v2130_v54 = vpop.eup %2129 }
 0x47f   : > { %936 = vadd.xlane.f32.xlu1 %v935_v53  ;;  %v1058_v57 = vsel %vm673_vm6, %v2130_v54, 0.0 }
 0x481   : > { %v2132_v55 = vpop.eup %2131 }
 0x482   : > { %v2134_v50 = vpop.eup %2133  ;;  %v1055_v56 = vsel %vm673_vm6, %v2132_v55, 0.0 }
 0x483   : > { %v2136_v58 = vpop.eup %2135  ;;  %1056 = vadd.xlane.f32.xlu0 %v1055_v56  ;;  %1059 = vadd.xlane.f32.xlu1 %v1058_v57  ;;  %v808_v60 = vsel %vm673_vm6, %v2134_v50, 0.0 }
 0x484   : > { %v811_v62 = vsel %vm673_vm6, %v2136_v58, 0.0 }
 0x487   : > { %809 = vadd.xlane.f32.xlu0 %v808_v60  ;;  %812 = vadd.xlane.f32.xlu1 %v811_v62 }
 0x498   : > { %943 = vrot.lane.b32.xlu1 %v2349_v59, %s2201_s26 }
 0x49c   : > { %1066 = vrot.lane.b32.xlu1 %v2349_v59, %s2200_s25 }
 0x49d   : > { %820 = vrot.lane.b32.xlu0 %v2349_v59, %s2199_s24 }
 0x504   : > { %v934_v63 = vpop.xlane.xlu0 %933 }
 0x508   : > { %v937_v0 = vpop.xlane.xlu1 %936 }
 0x50c   : > { %v1057_v2 = vpop.xlane.xlu0 %1056  ;;  %v1060_v3 = vpop.xlane.xlu1 %1059 }
 0x510   : > { %v810_v6 = vpop.xlane.xlu0 %809  ;;  %v813_v7 = vpop.xlane.xlu1 %812 }
 0x511   : > { %2137 = vrcp.f32 %v810_v6 }
 0x512   : > { %2139 = vrcp.f32 %v813_v7 }
 0x513   : > { %2141 = vrcp.f32 %v937_v0 }
 0x514   : > { %v821_v8 = vpop.permute.xlu0 %820  ;;  %2143 = vrcp.f32 %v934_v63  ;;  %v944_v14 = vpop.permute.xlu1 %943 }
 0x515   : > { %1946 = vmatpush3.bf16.msra.mxu1 %v821_v8  ;;  %2145 = vrcp.f32 %v1057_v2  ;;  %v1164_v8 = vsub.s32 1, %v2326_v32 }
 0x516   : > { %1957 = vmatprep.subr.bf16.mxu1 %v2196_v5  ;;  %2147 = vrcp.f32 %v1060_v3 }
 0x518   : > { %v1067_v27 = vpop.permute.xlu1 %1066 }
 0x51e   : > { %v2138_v9 = vpop.eup %2137 }
 0x51f   : > { %v2140_v10 = vpop.eup %2139  ;;  %v816_v11 = vmul.f32 %v2138_v9, %v2134_v50  ;;  %v1165_v9 = vrot.slane %v2334_v38, %v1164_v8 }
 0x520   : > { %v817_v59 = vmul.f32 %v2140_v10, %v2136_v58  ;;  %v2142_v13 = vpop.eup %2141 }
 0x521   : > { %v2144_v16 = vpop.eup %2143  ;;  %v941_v18 = vmul.f32 %v2142_v13, %v2128_v52 }
 0x522   : > { %v818_v12 = vpack.c.bf16 %v817_v59, %v816_v11  ;;  %v940_v19 = vmul.f32 %v2144_v16, %v2126_v51  ;;  %v2146_v20 = vpop.eup %2145 }
 0x523   : > { %v2148_v24 = vpop.eup %2147  ;;  %v1063_v28 = vmul.f32 %v2146_v20, %v2132_v55  ;;  %v2080_v20 = vld [vmem:[%s2265_s12 + $0x60] ss:$8 sps:$4 sm:$0xff]  }
 0x524   : > { %1948 = vmatmul.mubr.msk.bf16.vlgmr.msra.gmra.mxu1 %vm673_vm6, %v818_v12  ;;  %v942_v21 = vpack.c.bf16 %v941_v18, %v940_v19  ;;  %v1064_v29 = vmul.f32 %v2148_v24, %v2130_v54  ;;  %v2079_v18 = vld [vmem:[%s2265_s12 + $0x74] ss:$8 sps:$4 sm:$0xff]   ;;  %v2077_v19 = vld [vmem:[%s2265_s12 + $0x70] ss:$8 sps:$4 sm:$0xff]  }
 0x525   : > { %1958 = vmatpush3.bf16.msra.mxu1 %v944_v14  ;;  %1959 = vmatprep.mubr.msk.bf16.mxu1 %vm2197_vm0, %v2196_v5  ;;  %v2083_v24 = vld [vmem:[%s2265_s12 + $0x50] ss:$8 sps:$4 sm:$0xff]  }
 0x526   : > { %1969 = vmatprep.subr.bf16.mxu1 %v2196_v5  ;;  %v1065_v30 = vpack.c.bf16 %v1064_v29, %v1063_v28  ;;  %v2088_v28 = vld [vmem:[%s2265_s12 + $0x44] ss:$8 sps:$4 sm:$0xff]   ;;  %v2091_v29 = vld [vmem:[%s2265_s12 + $0x34] ss:$8 sps:$4 sm:$0xff]  }
 0x52c   : > { %1960 = vmatmul.mubr.msk.bf16.vlgmr.msra.gmra.mxu1 %vm673_vm6, %v942_v21  ;;  %v2085_v21 = vld [vmem:[%s2265_s12 + $0x54] ss:$8 sps:$4 sm:$0xff]  }
 0x52d   : > { %1970 = vmatpush3.bf16.msra.mxu1 %v1067_v27  ;;  %1971 = vmatprep.mubr.msk.bf16.mxu1 %vm2197_vm0, %v2196_v5  ;;  %v2086_v27 = vld [vmem:[%s2265_s12 + $0x40] ss:$8 sps:$4 sm:$0xff]  }
 0x52e   : > { %1401 = vmatprep.subr.bf16.mxu1 %v2079_v18  ;;  %v1315_v18 = vsub.s32 2, %v2326_v32 }
 0x534   : > { %1972 = vmatmul.mubr.msk.bf16.vlgmr.msra.gmra.mxu1 %vm673_vm6, %v1065_v30  ;;  %v2089_v30 = vld [vmem:[%s2265_s12 + $0x30] ss:$8 sps:$4 sm:$0xff]  }
 0x535   : > { %1433 = vmatprep.mubr.bf16.mxu1 %v2195_v4  ;;  %1402 = vmatpush1.bf16.msra.mxu1 %v2077_v19 }
 0x5e4   : > { %v860_v4 = vpop.f32.mrf.mxu1 }
 0x5e6   : > { %v1949_v39 = vpop.f32.mrf.mxu1 }
 0x5e7   : > { %v2101_v39 = vld [vmem:[%s2265_s12 + $0x170] ss:$8 sps:$4 sm:$0xff]  }
 0x5e8   : > { %v863_v23 = vpop.f32.mrf.mxu1  ;;  %1885 = vmatprep.subr.bf16.mxu0 %v2101_v39 }
 0x5e9   : > { %v2022_v40 = vpack.i.bf16 %v863_v23, %v860_v4  ;;  %v2098_v4 = vld [vmem:[%s2265_s12] ss:$8 sps:$4 sm:$0xff]  }
 0x5ea   : > { %v1950_v42 = vpop.f32.mrf.mxu1  ;;  %v2103_v23 = vld [vmem:[%s2265_s12 + $0x160] ss:$8 sps:$4 sm:$0xff]  }
 0x5eb   : > { %2023 = vrot.lane.b32.xlu1 %v2022_v40, %s2200_s25  ;;  %v2104_v40 = vld [vmem:[%s2265_s12 + $0xe0] ss:$8 sps:$4 sm:$0xff]   ;;  %v2106_v42 = vld [vmem:[%s2265_s12 + $0xd0] ss:$8 sps:$4 sm:$0xff]  }
 0x5ec   : > { %v983_v43 = vpop.f32.mrf.mxu1 }
 0x5ee   : > { %v1961_v44 = vpop.f32.mrf.mxu1 }
 0x5ef   : > { %v2108_v44 = vld [vmem:[%s2265_s12 + $0xc0] ss:$8 sps:$4 sm:$0xff]  }
 0x5f0   : > { %v986_v47 = vpop.f32.mrf.mxu1 }
 0x5f1   : > { %v2027_v15 = vpack.i.bf16 %v986_v47, %v983_v43  ;;  %v2107_v43 = vld [vmem:[%s2265_s12 + $0x140] ss:$8 sps:$4 sm:$0xff]   ;;  %v2110_v47 = vld [vmem:[%s2265_s12 + $0xb0] ss:$8 sps:$4 sm:$0xff]  }
 0x5f2   : > { %v1962_v17 = vpop.f32.mrf.mxu1 }
 0x5f3   : > { %2028 = vrot.lane.b32.xlu0 %v2027_v15, %s2201_s26 }
 0x5f4   : > { %v1106_v48 = vpop.f32.mrf.mxu1 }
 0x5f6   : > { %v1973_v49 = vpop.f32.mrf.mxu1 }
 0x5f8   : > { %v1109_v51 = vpop.f32.mrf.mxu1 }
 0x5f9   : > { %v2032_v45 = vpack.i.bf16 %v1109_v51, %v1106_v48 }
 0x5fa   : > { %v1974_v52 = vpop.f32.mrf.mxu1 }
 0x5fb   : > { %2033 = vrot.lane.b32.xlu1 %v2032_v45, %s2199_s24 }
 0x65d   : > { %v2024_v53 = vpop.permute.xlu1 %2023 }
 0x65e   : > { %v2026_v55 = vunpack.i.h.bf16 %v2024_v53  ;;  %v2025_v50 = vunpack.i.l.bf16 %v2024_v53 }
 0x660   : > { %v1138_v58 = vsel %vm623_vm1, %v2413_v1, %v2026_v55  ;;  %v1137_v60 = vsel %vm623_vm1, %v2411_v61, %v2025_v50 }
 0x665   : > { %v2029_v54 = vpop.permute.xlu0 %2028 }
 0x666   : > { %v2031_v56 = vunpack.i.h.bf16 %v2029_v54  ;;  %v2030_v5 = vunpack.i.l.bf16 %v2029_v54 }
 0x668   : > { %v1141_v0 = vsel %vm1139_vm9, %v1138_v58, %v2031_v56  ;;  %v1140_v2 = vsel %vm1139_vm9, %v1137_v60, %v2030_v5  ;;  %v1286_v58 = vsub.s32 4, %v2326_v32 }
 0x66d   : > { %v2034_v57 = vpop.permute.xlu1 %2033 }
 0x66e   : > { %v2036_v62 = vunpack.i.h.bf16 %v2034_v57  ;;  %v2035_v63 = vunpack.i.l.bf16 %v2034_v57 }
 0x670   : > { %v1144_v3 = vsel %vm1142_vm10, %v1141_v0, %v2036_v62  ;;  %v1143_v6 = vsel %vm1142_vm10, %v1140_v2, %v2035_v63  ;;  %v1287_v0 = vrot.slane %v2334_v38, %v1286_v58  ;;  %v1292_v2 = vsub.s32 5, %v2326_v32 }
 0x671   : > { %v1145_v7 = vpack.c.bf16 %v1144_v3, %v1143_v6 }
 0x673   : > { %1992 = vmatmul.mubr.bf16.vlgmr.msra.gmra.mxu0 %v1145_v7 }
 0x674   : > { %1886 = vmatpush3.bf16.msra.mxu0 %v2102_v22  ;;  %v1484_v22 = vsub.s32 3, %v2326_v32 }
 0x675   : > { %1887 = vmatprep.subr.bf16.mxu0 %v2103_v23 }
 0x676   : > { %v1485_v23 = vrot.slane %v2334_v38, %v1484_v22 }
 0x678   : > { %1888 = vmatpush3.bf16.msra.mxu0 %v2104_v40 }
 0x679   : > { %1889 = vmatprep.subr.bf16.mxu0 %v2105_v41 }
 0x67c   : > { %1890 = vmatpush3.bf16.msra.mxu0 %v2106_v42 }
 0x67d   : > { %1891 = vmatprep.subr.bf16.mxu0 %v2107_v43 }
 0x680   : > { %1892 = vmatpush3.bf16.msra.mxu0 %v2108_v44 }
 0x681   : > { %1893 = vmatprep.subr.bf16.mxu0 %v2109_v46 }
 0x684   : > { %1894 = vmatpush3.bf16.msra.mxu0 %v2110_v47 }
 0x733   : > { %v1248_v10 = vpop.f32.mrf.mxu0 }
 0x734   : > { %v1249_v11 = vadd.f32 %v1248_v10, %v1165_v9 }
 0x735   : > { %v1993_v1 = vpop.f32.mrf.mxu0 }
 0x736   : > { %v2486_v61 = vadd.f32 %v1249_v11, %v2305_v25 }
 0x737   : > { %v1251_v59 = vpop.f32.mrf.mxu0 }
 0x738   : > { %v1252_v12 = vadd.f32 %v1251_v59, %v1165_v9  ;;  %1257 = vadd.xlane.f32.xlu0 %v2486_v61  ;;  %v1264_v16 = vmul.f32 %v2486_v61, %v2486_v61  ;;  %v1293_v9 = vrot.slane %v2334_v38, %v1292_v2  ;;  %v2111_v59 = vld [vmem:[%s2265_s12 + $0x120] ss:$8 sps:$4 sm:$0xff]   ;;  %v1659_v2 = vsub.s32 7, %v2326_v32 }
 0x739   : > { %v1994_v13 = vpop.f32.mrf.mxu0  ;;  %1895 = vmatprep.subr.bf16.mxu0 %v2111_v59 }
 0x73a   : > { %v2490_v14 = vadd.f32 %v1252_v12, %v2307_v26  ;;  %v2082_v26 = vld [vmem:[%s2265_s12 + $0x64] ss:$8 sps:$4 sm:$0xff]   ;;  %v2112_v12 = vld [vmem:[%s2265_s12 + $0xa0] ss:$8 sps:$4 sm:$0xff]   ;;  %v2113_v13 = vld [vmem:[%s2265_s12 + $0x110] ss:$8 sps:$4 sm:$0xff]  }
 0x73b   : > { %1403 = vmatprep.subr.bf16.mxu1 %v2082_v26  ;;  %1896 = vmatpush3.bf16.msra.mxu0 %v2112_v12  ;;  %v1320_v26 = vrot.slane %v2329_v34, %v1315_v18 }
 0x73c   : > { %1266 = vadd.xlane.f32.xlu0 %v1264_v16  ;;  %1259 = vadd.xlane.f32.xlu1 %v2490_v14  ;;  %v1265_v25 = vmul.f32 %v2490_v14, %v2490_v14  ;;  %v2114_v16 = vld [vmem:[%s2265_s12 + $0x90] ss:$8 sps:$4 sm:$0xff]  }
 0x73d   : > { %1404 = vmatpush1.bf16.msra.mxu1 %v2080_v20  ;;  %1897 = vmatprep.subr.bf16.mxu0 %v2113_v13  ;;  %v1316_v20 = vrot.slane %v2334_v38, %v1315_v18 }
 0x73e   : > { %1405 = vmatprep.subr.bf16.mxu1 %v2085_v21 }
 0x73f   : > { %1898 = vmatpush3.bf16.msra.mxu0 %v2114_v16 }
 0x740   : > { %1268 = vadd.xlane.f32.xlu0 %v1265_v25  ;;  %v2116_v25 = vld [vmem:[%s2265_s12 + $0x80] ss:$8 sps:$4 sm:$0xff]  }
 0x741   : > { %1406 = vmatpush1.bf16.msra.mxu1 %v2083_v24 }
 0x742   : > { %1407 = vmatprep.subr.bf16.mxu1 %v2088_v28 }
 0x745   : > { %1408 = vmatpush1.bf16.msra.mxu1 %v2086_v27 }
 0x746   : > { %1409 = vmatprep.subr.bf16.mxu1 %v2091_v29 }
 0x749   : > { %1410 = vmatpush1.bf16.msra.mxu1 %v2089_v30 }
 0x74a   : > { %1411 = vmatprep.subr.bf16.mxu1 %v2094_v31 }
 0x74d   : > { %1412 = vmatpush1.bf16.msra.mxu1 %v2092_v33 }
 0x74e   : > { %1413 = vmatprep.subr.bf16.mxu1 %v2097_v35 }
 0x751   : > { %1414 = vmatpush1.bf16.msra.mxu1 %v2095_v36 }
 0x752   : > { %1415 = vmatprep.subr.bf16.mxu1 %v2100_v37 }
 0x755   : > { %1416 = vmatpush1.bf16.msra.mxu1 %v2098_v4 }
 0x7c1   : > { %v1258_v15 = vpop.xlane.xlu0 %1257 }
 0x7c2   : > { %v1262_v17 = vmul.f32 0.0078125, %v1258_v15 }
 0x7c4   : > { %v1272_v51 = vmul.f32 %v1262_v17, %v1262_v17  ;;  %v1276_v60 = vsub.f32 %v2486_v61, %v1262_v17 }
 0x7c5   : > { %v1267_v48 = vpop.xlane.xlu0 %1266  ;;  %v1260_v49 = vpop.xlane.xlu1 %1259 }
 0x7c6   : > { %v1270_v45 = vmul.f32 0.0078125, %v1267_v48  ;;  %v1263_v52 = vmul.f32 0.0078125, %v1260_v49 }
 0x7c8   : > { %v1274_v53 = vsub.f32 %v1270_v45, %v1272_v51  ;;  %v1273_v50 = vmul.f32 %v1263_v52, %v1263_v52  ;;  %v1277_v3 = vsub.f32 %v2490_v14, %v1263_v52  ;;  %v2115_v14 = vld [vmem:[%s2265_s12 + $0x100] ss:$8 sps:$4 sm:$0xff]  }
 0x7c9   : > { %v1269_v54 = vpop.xlane.xlu0 %1268  ;;  %1899 = vmatprep.subr.bf16.mxu0 %v2115_v14 }
 0x7ca   : > { %v1278_v55 = vadd.f32 1e-05, %v1274_v53  ;;  %v1271_v56 = vmul.f32 0.0078125, %v1269_v54  ;;  %1900 = vmatpush3.bf16.msra.mxu0 %v2116_v25 }
 0x7cc   : > { %2149 = vrsqrt.f32 %v1278_v55  ;;  %v1275_v5 = vsub.f32 %v1271_v56, %v1273_v50 }
 0x7ce   : > { %v1279_v57 = vadd.f32 1e-05, %v1275_v5 }
 0x7d0   : > { %2151 = vrsqrt.f32 %v1279_v57 }
 0x7d9   : > { %v2150_v62 = vpop.eup %2149 }
 0x7da   : > { %v1282_v63 = vmul.f32 %v2150_v62, %v1276_v60 }
 0x7dc   : > { %v1288_v8 = vmul.f32 %v1287_v0, %v1282_v63 }
 0x7dd   : > { %v2152_v6 = vpop.eup %2151 }
 0x7de   : > { %v1283_v7 = vmul.f32 %v2152_v6, %v1277_v3  ;;  %v1294_v11 = vadd.f32 %v1293_v9, %v1288_v8 }
 0x7e0   : > { %v1289_v10 = vmul.f32 %v1287_v0, %v1283_v7  ;;  %v1653_v0 = vsub.s32 6, %v2326_v32 }
 0x7e2   : > { %v1295_v1 = vadd.f32 %v1293_v9, %v1289_v10  ;;  %v1654_v6 = vrot.slane %v2334_v38, %v1653_v0  ;;  %v1660_v9 = vrot.slane %v2334_v38, %v1659_v2 }
 0x7e4   : > { %v1296_v61 = vpack.c.bf16 %v1295_v1, %v1294_v11 }
 0x7e6   : > { %1434 = vmatmul.mubr.bf16.vlgmr.msra.gmra.mxu1 %v1296_v61 }
 0x8a6   : > { %v1435_v19 = vpop.f32.mrf.mxu1 }
 0x8a7   : > { %v1436_v29 = vadd.f32 %v1435_v19, %v1316_v20 }
 0x8a8   : > { %v1437_v21 = vpop.f32.mrf.mxu1 }
 0x8a9   : > { %v1438_v27 = vadd.f32 %v1437_v21, %v1320_v26  ;;  %v1444_v37 = vmax.f32 %v1436_v29, 0.0 }
 0x8aa   : > { %v1439_v24 = vpop.f32.mrf.mxu1 }
 0x8ab   : > { %v1440_v28 = vadd.f32 %v1439_v24, %v1316_v20  ;;  %v1445_v35 = vmax.f32 %v1438_v27, 0.0 }
 0x8ac   : > { %v1441_v30 = vpop.f32.mrf.mxu1 }
 0x8ad   : > { %v1442_v31 = vadd.f32 %v1441_v30, %v1320_v26  ;;  %v1446_v33 = vmax.f32 %v1440_v28, 0.0 }
 0x8af   : > { %v1447_v36 = vmax.f32 %v1442_v31, 0.0  ;;  %v1448_v39 = vpack.c.bf16 %v1446_v33, %v1444_v37 }
 0x8b1   : > { %v1449_v4 = vpack.c.bf16 %v1447_v36, %v1445_v35 }
 0x8b3   : > { %1614 = vmatprep.mubr.bf16.mxu0 %v1449_v4 }
 0x8b4   : > { %1615 = vmatmul.mubr.bf16.vlgmr.msra.gmra.mxu0 %v1448_v39 }
 0x974   : > { %v1901_v34 = vpop.f32.mrf.mxu0 }
 0x976   : > { %v1902_v40 = vpop.f32.mrf.mxu0 }
 0x977   : > { %v1903_v41 = vadd.f32 %v1902_v40, %v1901_v34 }
 0x978   : > { %v1904_v42 = vpop.f32.mrf.mxu0 }
 0x979   : > { %v1617_v43 = vadd.f32 %v1903_v41, %v1485_v23 }
 0x97a   : > { %v1905_v44 = vpop.f32.mrf.mxu0 }
 0x97b   : > { %v1906_v46 = vadd.f32 %v1905_v44, %v1904_v42  ;;  %v1623_v47 = vadd.f32 %v1617_v43, %v1294_v11 }
 0x97d   : > { %v1620_v15 = vadd.f32 %v1906_v46, %v1485_v23  ;;  %1625 = vadd.xlane.f32.xlu0 %v1623_v47  ;;  %v1631_v48 = vmul.f32 %v1623_v47, %v1623_v47 }
 0x97f   : > { %v1624_v17 = vadd.f32 %v1620_v15, %v1295_v1 }
 0x981   : > { %1627 = vadd.xlane.f32.xlu1 %v1624_v17  ;;  %1633 = vadd.xlane.f32.xlu0 %v1631_v48  ;;  %v1632_v49 = vmul.f32 %v1624_v17, %v1624_v17 }
 0x985   : > { %1635 = vadd.xlane.f32.xlu1 %v1632_v49 }
 0xa06   : > { %v1626_v51 = vpop.xlane.xlu0 %1625 }
 0xa07   : > { %v1629_v45 = vmul.f32 0.0078125, %v1626_v51 }
 0xa09   : > { %v1639_v54 = vmul.f32 %v1629_v45, %v1629_v45  ;;  %v1643_v3 = vsub.f32 %v1623_v47, %v1629_v45 }
 0xa0a   : > { %v1628_v52 = vpop.xlane.xlu1 %1627  ;;  %v1634_v53 = vpop.xlane.xlu0 %1633 }
 0xa0b   : > { %v1630_v55 = vmul.f32 0.0078125, %v1628_v52  ;;  %v1637_v50 = vmul.f32 0.0078125, %v1634_v53 }
 0xa0d   : > { %v1641_v56 = vsub.f32 %v1637_v50, %v1639_v54  ;;  %v1640_v57 = vmul.f32 %v1630_v55, %v1630_v55  ;;  %v1644_v10 = vsub.f32 %v1624_v17, %v1630_v55 }
 0xa0e   : > { %v1636_v5 = vpop.xlane.xlu1 %1635 }
 0xa0f   : > { %v1645_v58 = vadd.f32 1e-05, %v1641_v56  ;;  %v1638_v60 = vmul.f32 0.0078125, %v1636_v5 }
 0xa11   : > { %2153 = vrsqrt.f32 %v1645_v58  ;;  %v1642_v62 = vsub.f32 %v1638_v60, %v1640_v57 }
 0xa13   : > { %v1646_v63 = vadd.f32 1e-05, %v1642_v62 }
 0xa15   : > { %2155 = vrsqrt.f32 %v1646_v63 }
 0xa1e   : > { %v2154_v7 = vpop.eup %2153 }
 0xa1f   : > { %v1649_v8 = vmul.f32 %v2154_v7, %v1643_v3 }
 0xa21   : > { %v1655_v11 = vmul.f32 %v1654_v6, %v1649_v8 }
 0xa22   : > { %v2156_v1 = vpop.eup %2155 }
 0xa23   : > { %v1650_v61 = vmul.f32 %v2156_v1, %v1644_v10  ;;  %v1661_v59 = vadd.f32 %v1660_v9, %v1655_v11 }
 0xa25   : > { %v1656_v12 = vmul.f32 %v1654_v6, %v1650_v61  ;;  %1663 = vst [vmem:[#allocation3] sm:$0xff] %v1661_v59 }
 0xa27   : > { %v1662_v32 = vadd.f32 %v1660_v9, %v1656_v12 }
 0xa29   : > { %1664 = vst [vmem:[#allocation3 + $0x8] sm:$0xff] %v1662_v32 }
 0xa2a   : > { %2170 = shalt.err (!%p2167_p12)
}
 0xa2b   : > { %s2203_s30 = smov 128   ;;  %s2204_s7 = smov 8  }
 0xa2c   : > { %1999 = dma.vmem_to_hbm [thread:$0]  (%p2002_p5), %s1672_s28, 256, %s2565_s6, [#allocation4], %s2203_s30, %s2203_s30, %s2204_s7  }
 0xa2d   : > { %2188 = dma.done.wait (%p2002_p5), [#allocation4], 256  }
 0xa2e   : > { %2190 = vsyncadd (%p2002_p5), [#allocation4], 4294967040 }
 0xa2f PF: > { %s17_s21 = sadd.s32 1, %s2193_s21  }
 0xa30   : > { %p14_p13 = scmp.ge.s32.totalorder %s17_s21, 4  }
 0xa32   :  { %16 = sbr.rel (!%p14_p13) target bundleno = 1 (0x1), region = 122 }
 0xa37   :  { %1687 = vsyncpa [#allocation4], 1 }
 0xa38   :  { %1689 = vsyncpa [#allocation4 + $0x1], 1 }
 0xa39   :  { %1690 = vsyncmov [#allocation2] }
 0xa3c   :  { %s1691_s10 = vpop.sfrf %1690 }
 0xa3d   :  { %p1849_p0 = scmp.ne.s32.totalorder %s1691_s10, 0 }
 0xa3f   :  { %1695 = shalt.err (%p1849_p0)  }

</bundles_post_ra>
